<compile_context>
chip_gen: v5e
topology: v5e:2x2
jax: 0.10.0
libtpu: 0.0.40
codegen_flags: <defaults>
</compile_context>

<pallas_src>
import functools

import jax
import jax.numpy as jnp
from jax.experimental import pallas as pl
from jax.experimental.pallas import tpu as pltpu

LANES = 128


def _round_up(x, m):
    return (x + m - 1) // m * m


def ppo_kernel(x_ref, w_in_ref, b_in_ref, w_h_ref, b_h_ref,
               w_cat_ref, b_cat_ref, out_ref, *, nA, group):
    """One grid step: (steps_per_block * group) state rows -> packed outputs.

    Output slab columns: [action(0:nA) | logp(nA:2nA) | v(2nA:2nA+1) | pad
    (undefined)].  `group` is the per-call batch size the torch softmax(dim=0)
    normalizes over.
    """
    x = x_ref[...].astype(jnp.bfloat16)                       # (rows, nS)

    # h = relu(input_layer(state))
    h = jnp.dot(x, w_in_ref[...], preferred_element_type=jnp.float32) + b_in_ref[...]
    h = jnp.maximum(h, 0.0)

    # h = relu(hidden_layer(h))   (hidden_dims has length 2 -> one hidden layer)
    h = jnp.dot(h.astype(jnp.bfloat16), w_h_ref[...],
                preferred_element_type=jnp.float32) + b_h_ref[...]
    h = jnp.maximum(h, 0.0)

    # Fused heads in one lane-dense matmul:
    #   columns [0, nA)   -> concatenated per-head action logits
    #   column  nA        -> value head
    #   columns (nA, end) -> zero padding
    z = jnp.dot(h.astype(jnp.bfloat16), w_cat_ref[...],
                preferred_element_type=jnp.float32) + b_cat_ref[...]   # (rows, L)

    # torch softmax(dim=0): per original batch of `group` rows, per column.
    # Computed on the full lane tile (slicing to :nA first saves no compute);
    # value / pad columns yield meaningless softmax results that are never
    # stored -- the value is taken from pre-softmax z.
    rows, lanes = z.shape
    zg = z.reshape(rows // group, group, lanes)
    m = jnp.max(zg, axis=1, keepdims=True)
    e = jnp.exp(zg - m)
    s = jnp.sum(e, axis=1, keepdims=True)
    action = (e / s).reshape(rows, lanes)                      # exact normalization
    logp = ((zg - m) - jnp.log(s)).reshape(rows, lanes)        # log-sum-exp form

    out_ref[:, 0:nA] = action[:, 0:nA]
    out_ref[:, nA:2 * nA] = logp[:, 0:nA]
    out_ref[:, 2 * nA:2 * nA + 1] = z[:, nA:nA + 1]


def init_params(key, nS, hidden_dims, indicies):
    """Deterministic synthetic init (uniform, torch-Linear-like scale), f32."""
    def linear(key, fan_in, fan_out):
        kw, kb = jax.random.split(key)
        bound = 1.0 / jnp.sqrt(fan_in)
        w = jax.random.uniform(kw, (fan_in, fan_out), jnp.float32, -bound, bound)
        b = jax.random.uniform(kb, (1, fan_out), jnp.float32, -bound, bound)
        return w, b

    keys = jax.random.split(key, 3 + len(indicies))
    w_in, b_in = linear(keys[0], nS, hidden_dims[0])
    w_h, b_h = linear(keys[1], hidden_dims[0], hidden_dims[1])

    head_ws, head_bs = [], []
    for i, idx in enumerate(indicies):
        w, b = linear(keys[2 + i], hidden_dims[1], idx[1] - idx[0])
        head_ws.append(w)
        head_bs.append(b)
    w_act = jnp.concatenate(head_ws, axis=1)
    b_act = jnp.concatenate(head_bs, axis=1)

    w_v, b_v = linear(keys[-1], hidden_dims[1], 1)
    return dict(w_in=w_in, b_in=b_in, w_h=w_h, b_h=b_h,
                w_act=w_act, b_act=b_act, w_v=w_v, b_v=b_v)


def prepare_params(params):
    """One-time prep: fuse value head into the action matmul, pad the fused
    output axis to a lane multiple, store matmul weights in bf16 (f32 biases)."""
    w_cat = jnp.concatenate([params["w_act"], params["w_v"]], axis=1)   # (H1, nA+1)
    b_cat = jnp.concatenate([params["b_act"], params["b_v"]], axis=1)   # (1,  nA+1)
    pad_c = _round_up(w_cat.shape[1], LANES) - w_cat.shape[1]
    w_cat = jnp.pad(w_cat, ((0, 0), (0, pad_c)))
    b_cat = jnp.pad(b_cat, ((0, 0), (0, pad_c)))
    return dict(
        w_in=params["w_in"].astype(jnp.bfloat16), b_in=params["b_in"],
        w_h=params["w_h"].astype(jnp.bfloat16), b_h=params["b_h"],
        w_cat=w_cat.astype(jnp.bfloat16), b_cat=b_cat,
    )


def ppo_forward(states, prep, nA, *, steps_per_block=16):
    """states: (T, B, nS) -- T stacked independent PPO_net.forward calls, each a
    batch of B rows.  The softmax normalizes over each call's own batch axis
    (torch dim=0).  T = 1 is exactly the original single-call forward."""
    T, B, nS = states.shape
    steps_per_block = max(1, min(steps_per_block, T))
    assert (steps_per_block * B) % 8 == 0, "rows per block must be sublane-aligned"
    # TODO(synk): per-call batches whose row count is not a multiple of 8 would
    # need row padding plus a masked softmax; not needed for this module's usage.

    T_pad = _round_up(T, steps_per_block)
    x = states.reshape(T * B, nS)
    if T_pad != T:
        x = jnp.pad(x, ((0, (T_pad - T) * B), (0, 0)))

    rows_blk = steps_per_block * B
    rows_total = T_pad * B
    out_w = _round_up(2 * nA + 1, LANES)            # [action | logp | v | pad]
    grid = (T_pad // steps_per_block,)

    H0 = prep["w_in"].shape[1]
    H1 = prep["w_h"].shape[1]
    Lc = prep["w_cat"].shape[1]
    const = lambda i: (0, 0)                        # weights stay VMEM-resident

    flops = 2 * rows_total * (nS * H0 + H0 * H1 + H1 * Lc)
    bytes_accessed = (
        rows_total * nS * 4 + rows_total * out_w * 4
        + 2 * (prep["w_in"].size + prep["w_h"].size + prep["w_cat"].size)
        + 4 * (prep["b_in"].size + prep["b_h"].size + prep["b_cat"].size))

    out = pl.pallas_call(
        functools.partial(ppo_kernel, nA=nA, group=B),
        grid=grid,
        out_shape=jax.ShapeDtypeStruct((rows_total, out_w), jnp.float32),
        in_specs=[
            pl.BlockSpec((rows_blk, nS), lambda i: (i, 0)),   # state tile per step
            pl.BlockSpec((nS, H0), const),                    # w_in   (resident)
            pl.BlockSpec((1, H0), const),                     # b_in
            pl.BlockSpec((H0, H1), const),                    # w_h
            pl.BlockSpec((1, H1), const),                     # b_h
            pl.BlockSpec((H1, Lc), const),                    # w_cat (heads+value)
            pl.BlockSpec((1, Lc), const),                     # b_cat
        ],
        out_specs=pl.BlockSpec((rows_blk, out_w), lambda i: (i, 0)),
        compiler_params=pltpu.CompilerParams(
            dimension_semantics=("parallel",)),
        cost_estimate=pl.CostEstimate(
            flops=flops, transcendentals=rows_total * Lc,
            bytes_accessed=bytes_accessed),
    )(x, prep["w_in"], prep["b_in"], prep["w_h"], prep["b_h"],
      prep["w_cat"], prep["b_cat"])

    out = out[:T * B]
    action = out[:, :nA].reshape(T, B, nA)
    logp = out[:, nA:2 * nA].reshape(T, B, nA)
    v = out[:, 2 * nA:2 * nA + 1].reshape(T, B, 1)
    return action, logp, v


def ppo_forward_ref(states, prep, nA):
    """Pure-JAX reference mirroring the torch forward (same bf16 weights and
    bf16-operand matmuls with f32 accumulation, exact softmax / log-softmax)."""
    T, B, nS = states.shape
    x = states.reshape(T * B, nS).astype(jnp.bfloat16)
    h = jnp.maximum(jnp.dot(x, prep["w_in"],
                            preferred_element_type=jnp.float32) + prep["b_in"], 0.0)
    h = jnp.maximum(jnp.dot(h.astype(jnp.bfloat16), prep["w_h"],
                            preferred_element_type=jnp.float32) + prep["b_h"], 0.0)
    z = jnp.dot(h.astype(jnp.bfloat16), prep["w_cat"],
                preferred_element_type=jnp.float32) + prep["b_cat"]
    z = z.reshape(T, B, -1)
    logits = z[..., :nA]
    action = jax.nn.softmax(logits, axis=1)          # torch softmax dim=0 per call
    logp = jax.nn.log_softmax(logits, axis=1)
    v = z[..., nA:nA + 1]
    return action, logp, v


if __name__ == "__main__":
    # Shapes consistent with the module: nA = nS = 32, hidden_dims = (256, 128),
    # indicies split the 32 action logits into three heads; per-call batch B = 8
    # and T = 32 stacked independent forward calls (env steps) to fill the MXU.
    nA = 32
    B = 8
    T = 32
    hidden_dims = (256, 128)
    indicies = [(0, 8), (8, 16), (16, 32)]
    # grade_mask / terrain_mask are unused in the torch forward().
    # TODO(synk): the unbatched 1-D-state torch path (cat/softmax over the action
    # entries themselves) is not implemented; kernel covers the batched path.

    key = jax.random.PRNGKey(0)
    k_param, k_state = jax.random.split(key)
    params = init_params(k_param, nA, hidden_dims, indicies)
    prep = prepare_params(params)
    states = jax.random.normal(k_state, (T, B, nA), jnp.float32)

    action, logp, v = ppo_forward(states, prep, nA, steps_per_block=16)
    jax.block_until_ready((action, logp, v))

    a_ref, lp_ref, v_ref = ppo_forward_ref(states, prep, nA)
    assert action.shape == (T, B, nA) and logp.shape == (T, B, nA) and v.shape == (T, B, 1)
    assert jnp.allclose(action, a_ref, atol=2e-3, rtol=1e-2)
    assert jnp.allclose(logp, lp_ref, atol=3e-3, rtol=1e-2)
    assert jnp.allclose(v, v_ref, atol=3e-3, rtol=1e-2)
    # Exact normalization -> probabilities sum to 1 per original batch/column.
    assert jnp.allclose(jnp.sum(action, axis=1), 1.0, atol=1e-3)

    # T = 1 is exactly the original single-call torch forward (softmax over the
    # whole batch); also exercises the small-grid / partial-stack path.
    a1, lp1, v1 = ppo_forward(states[:1], prep, nA, steps_per_block=16)
    jax.block_until_ready((a1, lp1, v1))
    assert jnp.allclose(a1, a_ref[:1], atol=2e-3, rtol=1e-2)
    assert jnp.allclose(lp1, lp_ref[:1], atol=3e-3, rtol=1e-2)
    assert jnp.allclose(v1, v_ref[:1], atol=3e-3, rtol=1e-2)

    print("KERNEL_OK")
</pallas_src>

<mosaic_0001>
module attributes {stable_mosaic.version = 11 : i64} {
  func.func @ppo_kernel(%arg0: i32, %arg1: memref<128x32xf32, #tpu.memory_space<vmem>>, %arg2: memref<32x256xbf16, #tpu.memory_space<vmem>>, %arg3: memref<1x256xf32, #tpu.memory_space<vmem>>, %arg4: memref<256x128xbf16, #tpu.memory_space<vmem>>, %arg5: memref<1x128xf32, #tpu.memory_space<vmem>>, %arg6: memref<128x128xbf16, #tpu.memory_space<vmem>>, %arg7: memref<1x128xf32, #tpu.memory_space<vmem>>, %arg8: memref<128x128xf32, #tpu.memory_space<vmem>>) attributes {dimension_semantics = [#tpu.dimension_semantics<parallel>], iteration_bounds = array<i64: 2>, scalar_prefetch = 0 : i64, scratch_operands = 0 : i64, tpu.core_type = #tpu.core_type<tc>, window_params = [{transform_indices = @transform_0, window_bounds = array<i64: 128, 32>}, {pipeline_mode = #tpu.pipeline_mode<synchronous>, transform_indices = @transform_1, window_bounds = array<i64: 32, 256>}, {pipeline_mode = #tpu.pipeline_mode<synchronous>, transform_indices = @transform_2, window_bounds = array<i64: 1, 256>}, {pipeline_mode = #tpu.pipeline_mode<synchronous>, transform_indices = @transform_3, window_bounds = array<i64: 256, 128>}, {pipeline_mode = #tpu.pipeline_mode<synchronous>, transform_indices = @transform_4, window_bounds = array<i64: 1, 128>}, {pipeline_mode = #tpu.pipeline_mode<synchronous>, transform_indices = @transform_5, window_bounds = array<i64: 128, 128>}, {pipeline_mode = #tpu.pipeline_mode<synchronous>, transform_indices = @transform_6, window_bounds = array<i64: 1, 128>}, {transform_indices = @transform_7, window_bounds = array<i64: 128, 128>}]} {
    %c0 = arith.constant 0 : index
    %c0_0 = arith.constant 0 : index
    %0 = vector.load %arg1[%c0, %c0_0] : memref<128x32xf32, #tpu.memory_space<vmem>>, vector<128x32xf32>
    %1 = arith.truncf %0 : vector<128x32xf32> to vector<128x32xbf16>
    %c0_1 = arith.constant 0 : index
    %c0_2 = arith.constant 0 : index
    %2 = vector.load %arg2[%c0_1, %c0_2] : memref<32x256xbf16, #tpu.memory_space<vmem>>, vector<32x256xbf16>
    %cst = arith.constant dense<0.000000e+00> : vector<128x256xf32>
    %3 = tpu.matmul %1, %2, %cst {dimension_numbers = #tpu.dot_dimension_numbers<[1], [0], [0], [1], [0, 0, 1, 1], [], []>} : vector<128x32xbf16>, vector<32x256xbf16>, vector<128x256xf32> -> vector<128x256xf32>
    %c0_3 = arith.constant 0 : index
    %c0_4 = arith.constant 0 : index
    %4 = vector.load %arg3[%c0_3, %c0_4] : memref<1x256xf32, #tpu.memory_space<vmem>>, vector<1x256xf32>
    %5 = vector.broadcast %4 : vector<1x256xf32> to vector<128x256xf32>
    %6 = arith.addf %3, %5 : vector<128x256xf32>
    %cst_5 = arith.constant 0.000000e+00 : f32
    %7 = vector.broadcast %cst_5 : f32 to vector<128x256xf32>
    %8 = arith.maximumf %6, %7 : vector<128x256xf32>
    %9 = arith.truncf %8 : vector<128x256xf32> to vector<128x256xbf16>
    %c0_6 = arith.constant 0 : index
    %c0_7 = arith.constant 0 : index
    %10 = vector.load %arg4[%c0_6, %c0_7] : memref<256x128xbf16, #tpu.memory_space<vmem>>, vector<256x128xbf16>
    %cst_8 = arith.constant dense<0.000000e+00> : vector<128x128xf32>
    %11 = tpu.matmul %9, %10, %cst_8 {dimension_numbers = #tpu.dot_dimension_numbers<[1], [0], [0], [1], [0, 0, 1, 1], [], []>} : vector<128x256xbf16>, vector<256x128xbf16>, vector<128x128xf32> -> vector<128x128xf32>
    %c0_9 = arith.constant 0 : index
    %c0_10 = arith.constant 0 : index
    %12 = vector.load %arg5[%c0_9, %c0_10] : memref<1x128xf32, #tpu.memory_space<vmem>>, vector<1x128xf32>
    %13 = vector.broadcast %12 : vector<1x128xf32> to vector<128x128xf32>
    %14 = arith.addf %11, %13 : vector<128x128xf32>
    %cst_11 = arith.constant 0.000000e+00 : f32
    %15 = vector.broadcast %cst_11 : f32 to vector<128x128xf32>
    %16 = arith.maximumf %14, %15 : vector<128x128xf32>
    %17 = arith.truncf %16 : vector<128x128xf32> to vector<128x128xbf16>
    %c0_12 = arith.constant 0 : index
    %c0_13 = arith.constant 0 : index
    %18 = vector.load %arg6[%c0_12, %c0_13] : memref<128x128xbf16, #tpu.memory_space<vmem>>, vector<128x128xbf16>
    %cst_14 = arith.constant dense<0.000000e+00> : vector<128x128xf32>
    %19 = tpu.matmul %17, %18, %cst_14 {dimension_numbers = #tpu.dot_dimension_numbers<[1], [0], [0], [1], [0, 0, 1, 1], [], []>} : vector<128x128xbf16>, vector<128x128xbf16>, vector<128x128xf32> -> vector<128x128xf32>
    %c0_15 = arith.constant 0 : index
    %c0_16 = arith.constant 0 : index
    %20 = vector.load %arg7[%c0_15, %c0_16] : memref<1x128xf32, #tpu.memory_space<vmem>>, vector<1x128xf32>
    %21 = vector.broadcast %20 : vector<1x128xf32> to vector<128x128xf32>
    %22 = arith.addf %19, %21 : vector<128x128xf32>
    %23 = vector.shape_cast %22 : vector<128x128xf32> to vector<16x8x128xf32>
    %cst_17 = arith.constant dense<0xFF800000> : vector<16x128xf32>
    %24 = vector.multi_reduction <maximumf>, %23, %cst_17 [1] : vector<16x8x128xf32> to vector<16x128xf32>
    %25 = vector.shape_cast %24 : vector<16x128xf32> to vector<16x1x128xf32>
    %26 = vector.broadcast %25 : vector<16x1x128xf32> to vector<16x8x128xf32>
    %27 = arith.subf %23, %26 : vector<16x8x128xf32>
    %28 = math.exp %27 : vector<16x8x128xf32>
    %cst_18 = arith.constant dense<0.000000e+00> : vector<16x128xf32>
    %29 = vector.multi_reduction <add>, %28, %cst_18 [1] : vector<16x8x128xf32> to vector<16x128xf32>
    %30 = vector.shape_cast %29 : vector<16x128xf32> to vector<16x1x128xf32>
    %31 = vector.broadcast %30 : vector<16x1x128xf32> to vector<16x8x128xf32>
    %32 = arith.divf %28, %31 : vector<16x8x128xf32>
    %33 = vector.shape_cast %32 : vector<16x8x128xf32> to vector<128x128xf32>
    %34 = vector.broadcast %25 : vector<16x1x128xf32> to vector<16x8x128xf32>
    %35 = arith.subf %23, %34 : vector<16x8x128xf32>
    %36 = math.log %30 : vector<16x1x128xf32>
    %37 = vector.broadcast %36 : vector<16x1x128xf32> to vector<16x8x128xf32>
    %38 = arith.subf %35, %37 : vector<16x8x128xf32>
    %39 = vector.shape_cast %38 : vector<16x8x128xf32> to vector<128x128xf32>
    %40 = vector.extract_strided_slice %33 {offsets = [0, 0], sizes = [128, 32], strides = [1, 1]} : vector<128x128xf32> to vector<128x32xf32>
    %c0_19 = arith.constant 0 : index
    %c0_20 = arith.constant 0 : index
    %41 = vector.load %arg8[%c0_19, %c0_20] : memref<128x128xf32, #tpu.memory_space<vmem>>, vector<128x32xf32>
    tpu.vector_store %arg8[%c0_19, %c0_20], %40 {strides = array<i32>} : memref<128x128xf32, #tpu.memory_space<vmem>>, vector<128x32xf32>,
    %42 = vector.extract_strided_slice %39 {offsets = [0, 0], sizes = [128, 32], strides = [1, 1]} : vector<128x128xf32> to vector<128x32xf32>
    %c0_21 = arith.constant 0 : index
    %c32 = arith.constant 32 : index
    %43 = vector.load %arg8[%c0_21, %c32] : memref<128x128xf32, #tpu.memory_space<vmem>>, vector<128x32xf32>
    tpu.vector_store %arg8[%c0_21, %c32], %42 {strides = array<i32>} : memref<128x128xf32, #tpu.memory_space<vmem>>, vector<128x32xf32>,
    %44 = vector.extract_strided_slice %22 {offsets = [0, 32], sizes = [128, 1], strides = [1, 1]} : vector<128x128xf32> to vector<128x1xf32>
    %c0_22 = arith.constant 0 : index
    %c64 = arith.constant 64 : index
    %45 = vector.load %arg8[%c0_22, %c64] : memref<128x128xf32, #tpu.memory_space<vmem>>, vector<128x1xf32>
    tpu.vector_store %arg8[%c0_22, %c64], %44 {strides = array<i32>} : memref<128x128xf32, #tpu.memory_space<vmem>>, vector<128x1xf32>,
    return
  }
  func.func @transform_0(%arg0: i32) -> (i32, i32) {
    %c0_i32 = arith.constant 0 : i32
    %c0_i32_0 = arith.constant 0 : i32
    return %arg0, %c0_i32 : i32, i32
  }
  func.func @transform_1(%arg0: i32) -> (i32, i32) {
    %c0_i32 = arith.constant 0 : i32
    %c0_i32_0 = arith.constant 0 : i32
    %c0_i32_1 = arith.constant 0 : i32
    return %c0_i32, %c0_i32_0 : i32, i32
  }
  func.func @transform_2(%arg0: i32) -> (i32, i32) {
    %c0_i32 = arith.constant 0 : i32
    %c0_i32_0 = arith.constant 0 : i32
    %c0_i32_1 = arith.constant 0 : i32
    return %c0_i32, %c0_i32_0 : i32, i32
  }
  func.func @transform_3(%arg0: i32) -> (i32, i32) {
    %c0_i32 = arith.constant 0 : i32
    %c0_i32_0 = arith.constant 0 : i32
    %c0_i32_1 = arith.constant 0 : i32
    return %c0_i32, %c0_i32_0 : i32, i32
  }
  func.func @transform_4(%arg0: i32) -> (i32, i32) {
    %c0_i32 = arith.constant 0 : i32
    %c0_i32_0 = arith.constant 0 : i32
    %c0_i32_1 = arith.constant 0 : i32
    return %c0_i32, %c0_i32_0 : i32, i32
  }
  func.func @transform_5(%arg0: i32) -> (i32, i32) {
    %c0_i32 = arith.constant 0 : i32
    %c0_i32_0 = arith.constant 0 : i32
    %c0_i32_1 = arith.constant 0 : i32
    return %c0_i32, %c0_i32_0 : i32, i32
  }
  func.func @transform_6(%arg0: i32) -> (i32, i32) {
    %c0_i32 = arith.constant 0 : i32
    %c0_i32_0 = arith.constant 0 : i32
    %c0_i32_1 = arith.constant 0 : i32
    return %c0_i32, %c0_i32_0 : i32, i32
  }
  func.func @transform_7(%arg0: i32) -> (i32, i32) {
    %c0_i32 = arith.constant 0 : i32
    %c0_i32_0 = arith.constant 0 : i32
    return %arg0, %c0_i32 : i32, i32
  }
}

</mosaic_0001>

<bundles_post_ra>
// kernel: tpu_custom_call.1
= control target key start
LH: loop header
LB: loop body
LE: loop exit
PB: predicated region body
PF: predicated region fallthrough
CT: control target
= control target key end

     0   :  { %12 = vsyncpa [#allocation3], 0  ;;  %s2991_s0 = inlined_call_operand.vmem [shape: f32[256,32], index: 0, kind: input, shape index: {}]   ;;  %s2992_s1 = inlined_call_operand.vmem [shape: bf16[32,256], index: 1, kind: input, shape index: {}]   ;;  %s2993_s2 = inlined_call_operand.vmem [shape: f32[1,256], index: 2, kind: input, shape index: {}]   ;;  %s2994_s3 = inlined_call_operand.vmem [shape: bf16[256,128], index: 3, kind: input, shape index: {}]   ;;  %s2995_s4 = inlined_call_operand.vmem [shape: f32[1,128], index: 4, kind: input, shape index: {}]   ;;  %s2996_s5 = inlined_call_operand.vmem [shape: bf16[128,128], index: 5, kind: input, shape index: {}]   ;;  %s2997_s6 = inlined_call_operand.vmem [shape: f32[1,128], index: 6, kind: input, shape index: {}]   ;;  %s2998_s7 = inlined_call_operand.hbm [shape: f32[256,128], index: 7, kind: output, shape index: {}]  }
   0x1   :  { %14 = vsyncpa [#allocation3 + $0x1], 0  ;;  %s2083_s24 = smov 0   ;;  %s2085_s25 = smov 0  }
   0x2   :  { %s2087_s26 = smov 0   ;;  %s2089_s27 = smov 0  }
   0x3 LB: > { %s2104_s28 = sadd.s32 4294967295, %s2038_s27   ;;  %s1661_s29 = sadd.s32 4294967294, %s2038_s27   ;;  %s2038_s27 = sphi %s2089_s27, %s3028_s27   ;;  %s2034_s26 = sphi %s2087_s26, %s3027_s26   ;;  %s2030_s25 = sphi %s2085_s25, %s3026_s25   ;;  %s2026_s24 = sphi %s2083_s24, %s3025_s24  }
   0x4   : > { %s2108_s30 = sadd.s32 1, %s2038_s27   ;;  %s179_s8 = sadd.s32 1, %s2034_s26 }
   0x5   : > { %s176_s9 = ssub.s32 %s2038_s27, %s2108_s30  ;;  %p189_p0 = scmp.ne.s32.totalorder %s2034_s26, %s2030_s25 }
   0x6   : > { %p177_p1 = scmp.eq.s32.totalorder %s176_s9, 0  ;;  %p190_p2 = scmp.eq.s32.totalorder %s2104_s28, 1 }
   0x7   : > { %p195_p3 = scmp.ne.s32.totalorder %s2030_s25, %s2026_s24  ;;  %p196_p4 = scmp.eq.s32.totalorder %s1661_s29, 1 }
   0x8   : > { %s2119_s10 = scalar_select %p177_p1, %s2034_s26, %s179_s8  }
   0x9   : > { %p2121_p5 = por %p190_p2, %p189_p0  ;;  %p2125_p6 = por %p196_p4, %p195_p3 }
   0xa   : > { %p1664_p7 = scmp.ge.s32.totalorder %s2038_s27, 1  ;;  %p241_p8 = scmp.lt.s32.totalorder %s2038_s27, 3 }
   0xc   : > { %p242_p9 = pnand %p1664_p7, %p241_p8 }
   0xd   : > { %s1666_s21 = sshll.u32 (!%p242_p9), %s2104_s28, 4  ;;  %s2040_s18 = smov (!%p242_p9), 32  }
   0xe   : > { %245 = sbr.rel (%p242_p9) target bundleno = 785 (0x311), region = 48  ;;  %p274_p10 = scmp.lt.s32.totalorder (!%p242_p9), %s1666_s21, 31 }
   0xf   : > { %s270_s20 = sand.u32 (!%p242_p9), 1, %s2030_s25   ;;  %s1829_s23 = sshll.u32 (!%p242_p9), %s2104_s28, 7 }
  0x10   : > { %s1584_s28 = scalar_lea.sflag (!%p242_p9), [#allocation3], %s270_s20 }
  0x13   : > { %v1678_v0 = vld [vmem:[%s2992_s1 + $0x10] sm:$0xf]  ;;  %v1804_v1 = vld [vmem:[%s2992_s1 + $0x14] sm:$0xf0]  ;;  %v1670_v2 = vld [vmem:[%s2992_s1] sm:$0xf] }
  0x14   : > { %v1679_v3 = vor.u32 %v1804_v1, %v1678_v0  ;;  %v1802_v4 = vld [vmem:[%s2992_s1 + $0x4] sm:$0xf0]  ;;  %v1803_v5 = vld [vmem:[%s2992_s1 + $0x14] sm:$0xf]  ;;  %v1680_v6 = vld [vmem:[%s2992_s1 + $0x18] sm:$0xf0] }
  0x15   : > { %v1671_v7 = vor.u32 %v1802_v4, %v1670_v2  ;;  %s3030_s21 = smov (!%p274_p10, %s1666_s21), 31  ;;  %v1683_v8 = vor.u32 %v1803_v5, %v1680_v6  ;;  %v1801_v9 = vld [vmem:[%s2992_s1 + $0x4] sm:$0xf]  ;;  %v1672_v10 = vld [vmem:[%s2992_s1 + $0x8] sm:$0xf0]  ;;  %vm335_vm0 = vcmask 261120  }
  0x16   : > { %366 = vmatpush.bf16.msra.mxu0 %v1679_v3  ;;  %1830 = vmatpush.bf16.msra.mxu1 %v1679_v3  ;;  %s1667_s9 = sshll.u32 %s3030_s21, 3  ;;  %v1675_v16 = vor.u32 %v1801_v9, %v1672_v10  ;;  %v1812_v29 = vld [vmem:[%s2994_s3 + $0x38] sm:$0xff]  ;;  %v1811_v31 = vld [vmem:[%s2994_s3 + $0x30] sm:$0xff]  ;;  %v1810_v34 = vld [vmem:[%s2994_s3 + $0x28] sm:$0xff]  ;;  %s1665_s21 = sshll.u32 %s270_s20, 7 }
  0x17   : > { %1831 = vmatpush.bf16.msra.mxu2 %v1679_v3  ;;  %1832 = vmatpush.bf16.msra.mxu3 %v1679_v3  ;;  %s2159_s19 = scalar_lea.vmem %s2991_s0, %s1667_s9  ;;  %v1809_v36 = vld [vmem:[%s2994_s3 + $0x20] sm:$0xff]  ;;  %v1808_v37 = vld [vmem:[%s2994_s3 + $0x18] sm:$0xff]  ;;  %v1807_v38 = vld [vmem:[%s2994_s3 + $0x10] sm:$0xff]  ;;  %s2424_s22 = scalar_lea.vmem [#allocation2], %s1665_s21 }
  0x18   : > { %v281_v11 = vld [vmem:[%s2159_s19] sm:$0xff]  ;;  %v282_v12 = vld [vmem:[%s2159_s19 + $0x8] sm:$0xff]  ;;  %v283_v18 = vld [vmem:[%s2159_s19 + $0x10] sm:$0xff]  ;;  %s1595_s9 = scalar_lea.hbm %s2998_s7, %s1829_s23 }
  0x19   : > { %v285_v13 = vld [vmem:[%s2159_s19 + $0x20] sm:$0xff]  ;;  %v297_v14 = vpack.c.bf16 %v282_v12, %v281_v11  ;;  %v286_v15 = vld [vmem:[%s2159_s19 + $0x28] sm:$0xff]  ;;  %v284_v19 = vld [vmem:[%s2159_s19 + $0x18] sm:$0xff]  ;;  %s1598_s13 = sshll.u32 %s1595_s9, 4  ;;  %s1599_s13 = int_to_ptr.hbm [resolvable:$true] %s1598_s13 }
  0x1a   : > { %367 = vmatpush.bf16.msra.mxu0 %v1671_v7  ;;  %1833 = vmatpush.bf16.msra.mxu1 %v1671_v7  ;;  %v299_v17 = vpack.c.bf16 %v286_v15, %v285_v13  ;;  %v287_v20 = vld [vmem:[%s2159_s19 + $0x30] sm:$0xff]  ;;  %v288_v21 = vld [vmem:[%s2159_s19 + $0x38] sm:$0xff]  ;;  %v298_v22 = vpack.c.bf16 %v284_v19, %v283_v18  ;;  %v289_v24 = vld [vmem:[%s2159_s19 + $0x40] sm:$0xff]  ;;  %s1990_s14 = sshra.s32 %s1599_s13, 4  ;;  %s1991_s14 = int_to_ptr.hbm [resolvable:$true] %s1990_s14 }
  0x1b   : > { %1834 = vmatpush.bf16.msra.mxu2 %v1671_v7  ;;  %1835 = vmatpush.bf16.msra.mxu3 %v1671_v7  ;;  %v300_v23 = vpack.c.bf16 %v288_v21, %v287_v20  ;;  %v290_v25 = vld [vmem:[%s2159_s19 + $0x48] sm:$0xff]  ;;  %v291_v27 = vld [vmem:[%s2159_s19 + $0x50] sm:$0xff]  ;;  %v292_v28 = vld [vmem:[%s2159_s19 + $0x58] sm:$0xff]  ;;  %s1992_s15 = scalar_lea.hbm %s1991_s14, 128  ;;  %p1997_p0 = scmp.lt.s32.totalorder %s1991_s14, %s2998_s7 }
  0x1c   : > { %v301_v26 = vpack.c.bf16 %v290_v25, %v289_v24  ;;  %v302_v30 = vpack.c.bf16 %v292_v28, %v291_v27  ;;  %v293_v32 = vld [vmem:[%s2159_s19 + $0x60] sm:$0xff]  ;;  %v294_v33 = vld [vmem:[%s2159_s19 + $0x68] sm:$0xff]  ;;  %v295_v40 = vld [vmem:[%s2159_s19 + $0x70] sm:$0xff]  ;;  %p1993_p11 = scmp.ne.s32.totalorder %s1991_s14, %s1992_s15 }
  0x1d   : > { %1684 = vmatmul.msk.bf16.vlgmr.msra.gmra.mxu0 %vm335_vm0, %v297_v14  ;;  %1686 = vmatmul.msk.bf16.vlgmr.msra.gmra.mxu1 %vm335_vm0, %v299_v17  ;;  %v303_v35 = vpack.c.bf16 %v294_v33, %v293_v32  ;;  %v1806_v39 = vld [vmem:[%s2994_s3 + $0x8] sm:$0xff]  ;;  %v296_v41 = vld [vmem:[%s2159_s19 + $0x78] sm:$0xff]  ;;  %v1805_v43 = vld [vmem:[%s2994_s3] sm:$0xff]  ;;  %s1596_s19 = sshll.u32 %s2424_s22, 4  ;;  %s1597_s19 = int_to_ptr.vmem [resolvable:$true] %s1596_s19 }
  0x1e   : > { %415 = vmatpush.bf16.msrb.mxu1 %v1683_v8  ;;  %1689 = vmatmul.msk.bf16.vlgmr.msra.gmra.mxu2 %vm335_vm0, %v302_v30  ;;  %v304_v42 = vpack.c.bf16 %v296_v41, %v295_v40  ;;  %v1820_v44 = vld [vmem:[%s2994_s3 + $0x78] sm:$0xff]  ;;  %v309_v45 = vld [vmem:[%s2993_s2] sm:$0x3]  ;;  %v1819_v49 = vld [vmem:[%s2994_s3 + $0x70] sm:$0xff]  ;;  %p1994_p12 = pnand %p1993_p11, %p2121_p5 }
  0x1f   : > { %638 = vmatpush.bf16.msrb.mxu2 %v1812_v29  ;;  %687 = vmatpush.bf16.msrb.mxu3 %v1820_v44  ;;  %v2220_v48 = vperm.slane %v309_v45, 0  ;;  %v1818_v51 = vld [vmem:[%s2994_s3 + $0x68] sm:$0xff]  ;;  %v1817_v57 = vld [vmem:[%s2994_s3 + $0x60] sm:$0xff]  ;;  %v1816_v59 = vld [vmem:[%s2994_s3 + $0x58] sm:$0xff] }
  0x20   : > { %1691 = vmatmul.msk.bf16.vlgmr.msra.gmra.mxu3 %vm335_vm0, %v304_v42  ;;  %v1815_v62 = vld [vmem:[%s2994_s3 + $0x50] sm:$0xff]  ;;  %v1814_v0 = vld [vmem:[%s2994_s3 + $0x48] sm:$0xff]  ;;  %v1813_v6 = vld [vmem:[%s2994_s3 + $0x40] sm:$0xff]  ;;  %p1995_p13 = pneg %p1994_p12 }
  0x22   : > { %416 = vmatpush.bf16.msrb.mxu1 %v1675_v16  ;;  %v2252_v16 = vperm.slane %v309_v45, 1 }
  0x23   : > { %639 = vmatpush.bf16.msrb.mxu2 %v1811_v31  ;;  %688 = vmatpush.bf16.msrb.mxu3 %v1819_v49 }
  0x27   : > { %640 = vmatpush.bf16.msrb.mxu2 %v1810_v34  ;;  %689 = vmatpush.bf16.msrb.mxu3 %v1818_v51 }
  0x2b   : > { %641 = vmatpush.bf16.msrb.mxu2 %v1809_v36  ;;  %690 = vmatpush.bf16.msrb.mxu3 %v1817_v57 }
  0x2d   : > { %1685 = vmatmul.msk.bf16.gmra.mxu0 %vm335_vm0, %v298_v22  ;;  %1687 = vmatmul.msk.bf16.gmra.mxu1 %vm335_vm0, %v300_v23 }
  0x2e   : > { %1690 = vmatmul.msk.bf16.gmra.mxu2 %vm335_vm0, %v303_v35 }
  0x2f   : > { %642 = vmatpush.bf16.msrb.mxu2 %v1808_v37  ;;  %691 = vmatpush.bf16.msrb.mxu3 %v1816_v59 }
  0x33   : > { %643 = vmatpush.bf16.msrb.mxu2 %v1807_v38  ;;  %692 = vmatpush.bf16.msrb.mxu3 %v1815_v62 }
  0x37   : > { %644 = vmatpush.bf16.msrb.mxu2 %v1806_v39  ;;  %693 = vmatpush.bf16.msrb.mxu3 %v1814_v0 }
  0x3b   : > { %645 = vmatpush.bf16.msrb.mxu2 %v1805_v43  ;;  %694 = vmatpush.bf16.msrb.mxu3 %v1813_v6 }
  0x3d   : > { %1688 = vmatmul.msk.bf16.gmra.mxu1 %vm335_vm0, %v301_v26 }
  0x4d   : > { %1692 = vmatmul.msk.bf16.vlgmr.msrb.gmra.mxu1 %vm335_vm0, %v297_v14 }
  0x5d   : > { %1693 = vmatmul.msk.bf16.gmra.mxu1 %vm335_vm0, %v298_v22 }
  0x6d   : > { %1694 = vmatmul.msk.bf16.gmra.mxu1 %vm335_vm0, %v299_v17 }
  0x7d   : > { %1695 = vmatmul.msk.bf16.gmra.mxu1 %vm335_vm0, %v300_v23 }
  0x8d   : > { %1696 = vmatmul.msk.bf16.gmra.mxu1 %vm335_vm0, %v301_v26 }
  0x9a   : > { %v369_v46 = vpop.f32.mrf.mxu0  ;;  %v379_v47 = vpop.f32.mrf.mxu1 }
  0x9b   : > { %v370_v50 = vadd.f32 %v369_v46, %v2220_v48  ;;  %v380_v10 = vadd.f32 %v379_v47, %v2220_v48 }
  0x9d   : > { %1697 = vmatmul.msk.bf16.gmra.mxu1 %vm335_vm0, %v302_v30  ;;  %v458_v53 = vmax.f32 %v370_v50, 0.0  ;;  %v466_v13 = vmax.f32 %v380_v10, 0.0 }
  0xa1   : > { %v394_v38 = vpop.f32.mrf.mxu2 }
  0xa2   : > { %v371_v52 = vpop.f32.mrf.mxu0  ;;  %v381_v55 = vpop.f32.mrf.mxu1 }
  0xa3   : > { %v372_v54 = vadd.f32 %v371_v52, %v2220_v48  ;;  %v382_v9 = vadd.f32 %v381_v55, %v2220_v48 }
  0xa5   : > { %v460_v56 = vmax.f32 %v372_v54, 0.0  ;;  %v468_v11 = vmax.f32 %v382_v9, 0.0 }
  0xa7   : > { %v490_v58 = vpack.c.bf16 %v460_v56, %v458_v53  ;;  %v494_v14 = vpack.c.bf16 %v468_v11, %v466_v13 }
  0xa9   : > { %646 = vmatmul.bf16.vlgmr.msrb.gmra.mxu2 %v490_v58  ;;  %v396_v43 = vpop.f32.mrf.mxu2 }
  0xaa   : > { %v374_v60 = vpop.f32.mrf.mxu0  ;;  %v384_v61 = vpop.f32.mrf.mxu1  ;;  %v397_v44 = vadd.f32 %v396_v43, %v2220_v48 }
  0xab   : > { %v375_v63 = vadd.f32 %v374_v60, %v2220_v48  ;;  %v385_v18 = vadd.f32 %v384_v61, %v2220_v48 }
  0xac   : > { %v480_v47 = vmax.f32 %v397_v44, 0.0 }
  0xad   : > { %1698 = vmatmul.msk.bf16.gmra.mxu1 %vm335_vm0, %v303_v35  ;;  %v462_v2 = vmax.f32 %v375_v63, 0.0  ;;  %v470_v23 = vmax.f32 %v385_v18, 0.0 }
  0xb1   : > { %v399_v54 = vpop.f32.mrf.mxu2 }
  0xb2   : > { %v376_v1 = vpop.f32.mrf.mxu0  ;;  %v386_v4 = vpop.f32.mrf.mxu1  ;;  %v400_v57 = vadd.f32 %v399_v54, %v2220_v48  ;;  %v2307_v54 = vld [vmem:[%s2995_s4] ss:$0 sm:$0xff] }
  0xb3   : > { %v377_v3 = vadd.f32 %v376_v1, %v2220_v48  ;;  %v387_v17 = vadd.f32 %v386_v4, %v2220_v48 }
  0xb4   : > { %v482_v61 = vmax.f32 %v400_v57, 0.0 }
  0xb5   : > { %v464_v5 = vmax.f32 %v377_v3, 0.0  ;;  %v472_v20 = vmax.f32 %v387_v17, 0.0 }
  0xb7   : > { %v492_v7 = vpack.c.bf16 %v464_v5, %v462_v2  ;;  %v496_v26 = vpack.c.bf16 %v472_v20, %v470_v23  ;;  %v404_v5 = vpop.f32.mrf.mxu3 }
  0xb9   : > { %651 = vmatmul.bf16.gmra.mxu2 %v492_v7  ;;  %v401_v58 = vpop.f32.mrf.mxu2  ;;  %v405_v7 = vadd.f32 %v404_v5, %v2220_v48 }
  0xba   : > { %v389_v8 = vpop.f32.mrf.mxu1  ;;  %v402_v59 = vadd.f32 %v401_v58, %v2220_v48 }
  0xbb   : > { %v390_v30 = vadd.f32 %v389_v8, %v2220_v48  ;;  %v486_v10 = vmax.f32 %v405_v7, 0.0 }
  0xbc   : > { %v484_v62 = vmax.f32 %v402_v59, 0.0 }
  0xbd   : > { %1699 = vmatmul.msk.bf16.gmra.mxu1 %vm335_vm0, %v304_v42  ;;  %v474_v35 = vmax.f32 %v390_v30, 0.0  ;;  %v395_v42 = vadd.f32 %v394_v38, %v2220_v48 }
  0xbe   : > { %v502_v3 = vpack.c.bf16 %v484_v62, %v482_v61 }
  0xbf   : > { %v478_v46 = vmax.f32 %v395_v42, 0.0  ;;  %v406_v8 = vpop.f32.mrf.mxu3 }
  0xc0   : > { %v407_v11 = vadd.f32 %v406_v8, %v2220_v48 }
  0xc1   : > { %v500_v53 = vpack.c.bf16 %v480_v47, %v478_v46 }
  0xc2   : > { %v391_v12 = vpop.f32.mrf.mxu1 }
  0xc3   : > { %v392_v29 = vadd.f32 %v391_v12, %v2220_v48  ;;  %v1828_v48 = vld [vmem:[%s2996_s5 + $0x38] sm:$0xff] }
  0xc4   : > { %828 = vmatpush.bf16.msrb.mxu0 %v1828_v48 }
  0xc5   : > { %v476_v32 = vmax.f32 %v392_v29, 0.0  ;;  %v1826_v29 = vld [vmem:[%s2996_s5 + $0x28] sm:$0xff] }
  0xc7   : > { %v498_v39 = vpack.c.bf16 %v476_v32, %v474_v35 }
  0xc9   : > { %656 = vmatmul.bf16.gmra.mxu2 %v494_v14  ;;  %v488_v14 = vmax.f32 %v407_v11, 0.0 }
  0xca   : > { %v418_v15 = vpop.f32.mrf.mxu1 }
  0xcb   : > { %v419_v19 = vadd.f32 %v418_v15, %v2252_v16  ;;  %v504_v18 = vpack.c.bf16 %v488_v14, %v486_v10 }
  0xcd   : > { %v459_v24 = vmax.f32 %v419_v19, 0.0 }
  0xd2   : > { %v420_v21 = vpop.f32.mrf.mxu1 }
  0xd3   : > { %v421_v22 = vadd.f32 %v420_v21, %v2252_v16 }
  0xd5   : > { %v461_v25 = vmax.f32 %v421_v22, 0.0 }
  0xd7   : > { %v491_v27 = vpack.c.bf16 %v461_v25, %v459_v24 }
  0xd9   : > { %661 = vmatmul.bf16.gmra.mxu2 %v496_v26  ;;  %695 = vmatmul.bf16.vlgmr.msrb.gmra.mxu3 %v491_v27 }
  0xda   : > { %v423_v28 = vpop.f32.mrf.mxu1 }
  0xdb   : > { %v424_v31 = vadd.f32 %v423_v28, %v2252_v16  ;;  %v1827_v28 = vld [vmem:[%s2996_s5 + $0x30] sm:$0xff] }
  0xdc   : > { %829 = vmatpush.bf16.msrb.mxu0 %v1827_v28 }
  0xdd   : > { %v463_v36 = vmax.f32 %v424_v31, 0.0 }
  0xe0   : > { %830 = vmatpush.bf16.msrb.mxu0 %v1826_v29 }
  0xe2   : > { %v425_v33 = vpop.f32.mrf.mxu1 }
  0xe3   : > { %v426_v34 = vadd.f32 %v425_v33, %v2252_v16  ;;  %v1825_v33 = vld [vmem:[%s2996_s5 + $0x20] sm:$0xff] }
  0xe4   : > { %831 = vmatpush.bf16.msrb.mxu0 %v1825_v33 }
  0xe5   : > { %v465_v37 = vmax.f32 %v426_v34, 0.0 }
  0xe7   : > { %v493_v40 = vpack.c.bf16 %v465_v37, %v463_v36  ;;  %v1824_v37 = vld [vmem:[%s2996_s5 + $0x18] sm:$0xff] }
  0xe8   : > { %832 = vmatpush.bf16.msrb.mxu0 %v1824_v37 }
  0xe9   : > { %666 = vmatmul.bf16.gmra.mxu2 %v498_v39  ;;  %700 = vmatmul.bf16.gmra.mxu3 %v493_v40  ;;  %v1823_v40 = vld [vmem:[%s2996_s5 + $0x10] sm:$0xff] }
  0xea   : > { %v428_v41 = vpop.f32.mrf.mxu1 }
  0xeb   : > { %v429_v45 = vadd.f32 %v428_v41, %v2252_v16  ;;  %v1822_v41 = vld [vmem:[%s2996_s5 + $0x8] sm:$0xff] }
  0xec   : > { %833 = vmatpush.bf16.msrb.mxu0 %v1823_v40 }
  0xed   : > { %v467_v51 = vmax.f32 %v429_v45, 0.0 }
  0xf0   : > { %834 = vmatpush.bf16.msrb.mxu0 %v1822_v41 }
  0xf2   : > { %v430_v49 = vpop.f32.mrf.mxu1 }
  0xf3   : > { %v431_v50 = vadd.f32 %v430_v49, %v2252_v16  ;;  %v1821_v49 = vld [vmem:[%s2996_s5] sm:$0xff] }
  0xf4   : > { %835 = vmatpush.bf16.msrb.mxu0 %v1821_v49 }
  0xf5   : > { %v469_v52 = vmax.f32 %v431_v50, 0.0 }
  0xf7   : > { %v495_v55 = vpack.c.bf16 %v469_v52, %v467_v51 }
  0xf9   : > { %671 = vmatmul.bf16.gmra.mxu2 %v500_v53  ;;  %705 = vmatmul.bf16.gmra.mxu3 %v495_v55 }
  0xfa   : > { %v433_v56 = vpop.f32.mrf.mxu1 }
  0xfb   : > { %v434_v60 = vadd.f32 %v433_v56, %v2252_v16 }
  0xfd   : > { %v471_v1 = vmax.f32 %v434_v60, 0.0 }
 0x102   : > { %v435_v63 = vpop.f32.mrf.mxu1 }
 0x103   : > { %v436_v0 = vadd.f32 %v435_v63, %v2252_v16 }
 0x105   : > { %v473_v2 = vmax.f32 %v436_v0, 0.0 }
 0x107   : > { %v497_v4 = vpack.c.bf16 %v473_v2, %v471_v1 }
 0x109   : > { %676 = vmatmul.bf16.gmra.mxu2 %v502_v3  ;;  %710 = vmatmul.bf16.gmra.mxu3 %v497_v4 }
 0x10a   : > { %v438_v6 = vpop.f32.mrf.mxu1 }
 0x10b   : > { %v439_v9 = vadd.f32 %v438_v6, %v2252_v16 }
 0x10d   : > { %v475_v15 = vmax.f32 %v439_v9, 0.0 }
 0x112   : > { %v440_v12 = vpop.f32.mrf.mxu1 }
 0x113   : > { %v441_v13 = vadd.f32 %v440_v12, %v2252_v16 }
 0x115   : > { %v477_v17 = vmax.f32 %v441_v13, 0.0 }
 0x117   : > { %v499_v19 = vpack.c.bf16 %v477_v17, %v475_v15 }
 0x119   : > { %681 = vmatmul.bf16.gmra.mxu2 %v504_v18  ;;  %715 = vmatmul.bf16.gmra.mxu3 %v499_v19 }
 0x11a   : > { %v443_v20 = vpop.f32.mrf.mxu1 }
 0x11b   : > { %v444_v21 = vadd.f32 %v443_v20, %v2252_v16 }
 0x11d   : > { %v479_v24 = vmax.f32 %v444_v21, 0.0 }
 0x122   : > { %v445_v22 = vpop.f32.mrf.mxu1 }
 0x123   : > { %v446_v23 = vadd.f32 %v445_v22, %v2252_v16 }
 0x125   : > { %v481_v25 = vmax.f32 %v446_v23, 0.0 }
 0x127   : > { %v501_v26 = vpack.c.bf16 %v481_v25, %v479_v24 }
 0x129   : > { %720 = vmatmul.bf16.gmra.mxu3 %v501_v26 }
 0x12a   : > { %v448_v27 = vpop.f32.mrf.mxu1 }
 0x12b   : > { %v449_v30 = vadd.f32 %v448_v27, %v2252_v16 }
 0x12c   : > { %v647_v39 = vpop.f32.mrf.mxu2 }
 0x12d   : > { %v483_v34 = vmax.f32 %v449_v30, 0.0 }
 0x132   : > { %v450_v31 = vpop.f32.mrf.mxu1 }
 0x133   : > { %v451_v32 = vadd.f32 %v450_v31, %v2252_v16 }
 0x134   : > { %v649_v47 = vpop.f32.mrf.mxu2 }
 0x135   : > { %v485_v35 = vmax.f32 %v451_v32, 0.0  ;;  %v650_v55 = vadd.f32 %v2307_v54, %v649_v47 }
 0x137   : > { %v503_v36 = vpack.c.bf16 %v485_v35, %v483_v34 }
 0x139   : > { %725 = vmatmul.bf16.gmra.mxu3 %v503_v36 }
 0x13a   : > { %v453_v38 = vpop.f32.mrf.mxu1 }
 0x13b   : > { %v454_v42 = vadd.f32 %v453_v38, %v2252_v16 }
 0x13c   : > { %v652_v51 = vpop.f32.mrf.mxu2 }
 0x13d   : > { %v487_v45 = vmax.f32 %v454_v42, 0.0  ;;  %v653_v1 = vadd.f32 %v2307_v54, %v652_v51 }
 0x142   : > { %v455_v43 = vpop.f32.mrf.mxu1 }
 0x143   : > { %v456_v44 = vadd.f32 %v455_v43, %v2252_v16  ;;  %v648_v16 = vadd.f32 %v2307_v54, %v647_v39 }
 0x144   : > { %v654_v52 = vpop.f32.mrf.mxu2 }
 0x145   : > { %v489_v46 = vmax.f32 %v456_v44, 0.0  ;;  %v655_v2 = vadd.f32 %v2307_v54, %v654_v52 }
 0x147   : > { %v505_v50 = vpack.c.bf16 %v489_v46, %v487_v45 }
 0x149   : > { %730 = vmatmul.bf16.gmra.mxu3 %v505_v50 }
 0x14c   : > { %v657_v57 = vpop.f32.mrf.mxu2 }
 0x14d   : > { %v658_v11 = vadd.f32 %v2307_v54, %v657_v57 }
 0x154   : > { %v659_v0 = vpop.f32.mrf.mxu2 }
 0x155   : > { %v660_v13 = vadd.f32 %v2307_v54, %v659_v0 }
 0x15c   : > { %v696_v53 = vpop.f32.mrf.mxu3  ;;  %v662_v8 = vpop.f32.mrf.mxu2 }
 0x15d   : > { %v697_v56 = vadd.f32 %v696_v53, %v648_v16  ;;  %v663_v23 = vadd.f32 %v2307_v54, %v662_v8 }
 0x15f   : > { %v736_v60 = vmax.f32 %v697_v56, 0.0 }
 0x164   : > { %v698_v58 = vpop.f32.mrf.mxu3  ;;  %v664_v12 = vpop.f32.mrf.mxu2 }
 0x165   : > { %v699_v59 = vadd.f32 %v698_v58, %v650_v55  ;;  %v665_v24 = vadd.f32 %v2307_v54, %v664_v12 }
 0x167   : > { %v737_v61 = vmax.f32 %v699_v59, 0.0 }
 0x169   : > { %v752_v62 = vpack.c.bf16 %v737_v61, %v736_v60 }
 0x16b   : > { %836 = vmatmul.bf16.vlgmr.msrb.gmra.mxu0 %v752_v62 }
 0x16c   : > { %v701_v63 = vpop.f32.mrf.mxu3  ;;  %v667_v21 = vpop.f32.mrf.mxu2 }
 0x16d   : > { %v702_v3 = vadd.f32 %v701_v63, %v653_v1  ;;  %v668_v33 = vadd.f32 %v2307_v54, %v667_v21 }
 0x16f   : > { %v738_v6 = vmax.f32 %v702_v3, 0.0 }
 0x174   : > { %v703_v4 = vpop.f32.mrf.mxu3  ;;  %v669_v27 = vpop.f32.mrf.mxu2 }
 0x175   : > { %v704_v5 = vadd.f32 %v703_v4, %v655_v2  ;;  %v670_v34 = vadd.f32 %v2307_v54, %v669_v27 }
 0x177   : > { %v739_v7 = vmax.f32 %v704_v5, 0.0 }
 0x179   : > { %v753_v9 = vpack.c.bf16 %v739_v7, %v738_v6 }
 0x17b   : > { %841 = vmatmul.bf16.gmra.mxu0 %v753_v9 }
 0x17c   : > { %v706_v10 = vpop.f32.mrf.mxu3  ;;  %v672_v32 = vpop.f32.mrf.mxu2 }
 0x17d   : > { %v707_v14 = vadd.f32 %v706_v10, %v658_v11  ;;  %v673_v43 = vadd.f32 %v2307_v54, %v672_v32  ;;  %v2328_v10 = vld [vmem:[%s2997_s6] ss:$0 sm:$0xff] }
 0x17f   : > { %v740_v18 = vmax.f32 %v707_v14, 0.0 }
 0x184   : > { %v708_v15 = vpop.f32.mrf.mxu3  ;;  %v674_v40 = vpop.f32.mrf.mxu2 }
 0x185   : > { %v709_v17 = vadd.f32 %v708_v15, %v660_v13  ;;  %v675_v45 = vadd.f32 %v2307_v54, %v674_v40 }
 0x187   : > { %v741_v19 = vmax.f32 %v709_v17, 0.0 }
 0x189   : > { %v754_v20 = vpack.c.bf16 %v741_v19, %v740_v18 }
 0x18b   : > { %846 = vmatmul.bf16.gmra.mxu0 %v754_v20 }
 0x18c   : > { %v711_v22 = vpop.f32.mrf.mxu3  ;;  %v677_v44 = vpop.f32.mrf.mxu2 }
 0x18d   : > { %v712_v25 = vadd.f32 %v711_v22, %v663_v23  ;;  %v678_v55 = vadd.f32 %v2307_v54, %v677_v44 }
 0x18f   : > { %v742_v28 = vmax.f32 %v712_v25, 0.0 }
 0x194   : > { %v713_v26 = vpop.f32.mrf.mxu3  ;;  %v679_v53 = vpop.f32.mrf.mxu2 }
 0x195   : > { %v714_v48 = vadd.f32 %v713_v26, %v665_v24  ;;  %v680_v56 = vadd.f32 %v2307_v54, %v679_v53 }
 0x197   : > { %v743_v29 = vmax.f32 %v714_v48, 0.0 }
 0x199   : > { %v755_v30 = vpack.c.bf16 %v743_v29, %v742_v28 }
 0x19b   : > { %851 = vmatmul.bf16.gmra.mxu0 %v755_v30 }
 0x19c   : > { %v716_v31 = vpop.f32.mrf.mxu3  ;;  %v682_v60 = vpop.f32.mrf.mxu2 }
 0x19d   : > { %v717_v35 = vadd.f32 %v716_v31, %v668_v33  ;;  %v683_v2 = vadd.f32 %v2307_v54, %v682_v60 }
 0x19f   : > { %v744_v38 = vmax.f32 %v717_v35, 0.0 }
 0x1a4   : > { %v718_v36 = vpop.f32.mrf.mxu3  ;;  %v684_v1 = vpop.f32.mrf.mxu2 }
 0x1a5   : > { %v719_v37 = vadd.f32 %v718_v36, %v670_v34  ;;  %v685_v3 = vadd.f32 %v2307_v54, %v684_v1 }
 0x1a7   : > { %v745_v39 = vmax.f32 %v719_v37, 0.0 }
 0x1a9   : > { %v756_v41 = vpack.c.bf16 %v745_v39, %v744_v38 }
 0x1ab   : > { %856 = vmatmul.bf16.gmra.mxu0 %v756_v41 }
 0x1ac   : > { %v721_v42 = vpop.f32.mrf.mxu3 }
 0x1ad   : > { %v722_v46 = vadd.f32 %v721_v42, %v673_v43 }
 0x1af   : > { %v746_v50 = vmax.f32 %v722_v46, 0.0 }
 0x1b4   : > { %v723_v47 = vpop.f32.mrf.mxu3 }
 0x1b5   : > { %v724_v49 = vadd.f32 %v723_v47, %v675_v45 }
 0x1b7   : > { %v747_v51 = vmax.f32 %v724_v49, 0.0 }
 0x1b9   : > { %v757_v52 = vpack.c.bf16 %v747_v51, %v746_v50 }
 0x1bb   : > { %861 = vmatmul.bf16.gmra.mxu0 %v757_v52 }
 0x1bc   : > { %v726_v16 = vpop.f32.mrf.mxu3 }
 0x1bd   : > { %v727_v57 = vadd.f32 %v726_v16, %v678_v55 }
 0x1bf   : > { %v748_v61 = vmax.f32 %v727_v57, 0.0 }
 0x1c4   : > { %v728_v58 = vpop.f32.mrf.mxu3 }
 0x1c5   : > { %v729_v59 = vadd.f32 %v728_v58, %v680_v56 }
 0x1c7   : > { %v749_v62 = vmax.f32 %v729_v59, 0.0 }
 0x1c9   : > { %v758_v63 = vpack.c.bf16 %v749_v62, %v748_v61 }
 0x1cb   : > { %866 = vmatmul.bf16.gmra.mxu0 %v758_v63 }
 0x1cc   : > { %v731_v0 = vpop.f32.mrf.mxu3 }
 0x1cd   : > { %v732_v4 = vadd.f32 %v731_v0, %v683_v2 }
 0x1cf   : > { %v750_v7 = vmax.f32 %v732_v4, 0.0 }
 0x1d4   : > { %v733_v5 = vpop.f32.mrf.mxu3 }
 0x1d5   : > { %v734_v6 = vadd.f32 %v733_v5, %v685_v3 }
 0x1d7   : > { %v751_v8 = vmax.f32 %v734_v6, 0.0 }
 0x1d9   : > { %v759_v9 = vpack.c.bf16 %v751_v8, %v750_v7 }
 0x1db   : > { %871 = vmatmul.bf16.gmra.mxu0 %v759_v9 }
 0x1e8   : > { %v837_v11 = vpop.f32.mrf.mxu0 }
 0x1e9   : > { %v838_v12 = vadd.f32 %v2328_v10, %v837_v11 }
 0x1eb   : > { %v877_v13 = vrot.slane %v838_v12, 4  ;;  %1518 = vrot.lane.b32.xlu1 %v838_v12, %s2040_s18 }
 0x1ed   : > { %v878_v54 = vmax.f32 %v838_v12, %v877_v13 }
 0x1ef   : > { %v879_v14 = vrot.slane %v878_v54, 2 }
 0x1f0   : > { %v839_v15 = vpop.f32.mrf.mxu0 }
 0x1f1   : > { %v840_v17 = vadd.f32 %v2328_v10, %v839_v15  ;;  %v880_v18 = vmax.f32 %v878_v54, %v879_v14 }
 0x1f3   : > { %v883_v19 = vrot.slane %v840_v17, 4  ;;  %1520 = vrot.lane.b32.xlu2 %v840_v17, %s2040_s18  ;;  %v881_v20 = vrot.slane %v880_v18, 1 }
 0x1f5   : > { %v884_v21 = vmax.f32 %v840_v17, %v883_v19  ;;  %v882_v22 = vmax.f32 %v880_v18, %v881_v20 }
 0x1f7   : > { %v885_v23 = vrot.slane %v884_v21, 2  ;;  %v2334_v24 = vsub.f32 %v838_v12, %v882_v22 }
 0x1f8   : > { %v842_v25 = vpop.f32.mrf.mxu0 }
 0x1f9   : > { %v843_v26 = vadd.f32 %v2328_v10, %v842_v25  ;;  %v989_v48 = vmul.f32 1.442695, %v2334_v24  ;;  %v886_v27 = vmax.f32 %v884_v21, %v885_v23 }
 0x1fb   : > { %v889_v28 = vrot.slane %v843_v26, 4  ;;  %1522 = vrot.lane.b32.xlu0 %v843_v26, %s2040_s18  ;;  %1880 = vpow2.f32 %v989_v48  ;;  %v887_v29 = vrot.slane %v886_v27, 1 }
 0x1fd   : > { %v890_v30 = vmax.f32 %v843_v26, %v889_v28  ;;  %v888_v31 = vmax.f32 %v886_v27, %v887_v29 }
 0x1ff   : > { %v891_v32 = vrot.slane %v890_v30, 2  ;;  %v2339_v33 = vsub.f32 %v840_v17, %v888_v31 }
 0x200   : > { %v844_v34 = vpop.f32.mrf.mxu0 }
 0x201   : > { %v2341_v35 = vpop.eup %1880  ;;  %v845_v36 = vadd.f32 %v2328_v10, %v844_v34  ;;  %v991_v37 = vmul.f32 1.442695, %v2339_v33  ;;  %v892_v38 = vmax.f32 %v890_v30, %v891_v32 }
 0x202   : > { %v1021_v39 = vrot.slane %v2341_v35, 4 }
 0x203   : > { %v895_v40 = vrot.slane %v845_v36, 4  ;;  %1524 = vrot.lane.b32.xlu1 %v845_v36, %s2040_s18  ;;  %1882 = vpow2.f32 %v991_v37  ;;  %v893_v41 = vrot.slane %v892_v38, 1 }
 0x204   : > { %v1022_v42 = vadd.f32 %v2341_v35, %v1021_v39 }
 0x205   : > { %v896_v43 = vmax.f32 %v845_v36, %v895_v40  ;;  %v894_v44 = vmax.f32 %v892_v38, %v893_v41 }
 0x206   : > { %v1023_v45 = vrot.slane %v1022_v42, 2 }
 0x207   : > { %v897_v46 = vrot.slane %v896_v43, 2  ;;  %v2348_v47 = vsub.f32 %v843_v26, %v894_v44 }
 0x208   : > { %v847_v49 = vpop.f32.mrf.mxu0  ;;  %v1024_v50 = vadd.f32 %v1023_v45, %v1022_v42 }
 0x209   : > { %v2350_v51 = vpop.eup %1882  ;;  %v848_v52 = vadd.f32 %v2328_v10, %v847_v49  ;;  %v993_v53 = vmul.f32 1.442695, %v2348_v47  ;;  %v898_v16 = vmax.f32 %v896_v43, %v897_v46 }
 0x20a   : > { %v1025_v55 = vrot.slane %v1024_v50, 1  ;;  %v1027_v56 = vrot.slane %v2350_v51, 4 }
 0x20b   : > { %v901_v57 = vrot.slane %v848_v52, 4  ;;  %1526 = vrot.lane.b32.xlu2 %v848_v52, %s2040_s18  ;;  %1884 = vpow2.f32 %v993_v53  ;;  %v899_v58 = vrot.slane %v898_v16, 1 }
 0x20c   : > { %v2356_v59 = vadd.f32 %v1025_v55, %v1024_v50  ;;  %v1028_v60 = vadd.f32 %v2350_v51, %v1027_v56 }
 0x20d   : > { %v902_v61 = vmax.f32 %v848_v52, %v901_v57  ;;  %v900_v62 = vmax.f32 %v898_v16, %v899_v58 }
 0x20e   : > { %1886 = vlog2.f32 %v2356_v59  ;;  %v1029_v63 = vrot.slane %v1028_v60, 2  ;;  %v1126_v25 = vand.u32 2147483647, %v2356_v59  ;;  %vm1122_vm1 = vweird.f32 %v2356_v59 }
 0x20f   : > { %v903_v0 = vrot.slane %v902_v61, 2  ;;  %1888 = vrcp.f32 %v2356_v59  ;;  %v2361_v1 = vsub.f32 %v845_v36, %v900_v62  ;;  %v1128_v28 = vand.u32 2147483648, %v2356_v59 }
 0x210   : > { %v849_v2 = vpop.f32.mrf.mxu0  ;;  %v1030_v3 = vadd.f32 %v1029_v63, %v1028_v60  ;;  %vm2393_vm3 = vcmp.eq.f32.partialorder %v1126_v25, 8.507059e+37 }
 0x211   : > { %v2363_v4 = vpop.eup %1884  ;;  %v850_v5 = vadd.f32 %v2328_v10, %v849_v2  ;;  %v995_v6 = vmul.f32 1.442695, %v2361_v1  ;;  %v904_v7 = vmax.f32 %v902_v61, %v903_v0  ;;  %v1129_v45 = vor.u32 1.1754944e-38, %v1128_v28 }
 0x212   : > { %v1031_v8 = vrot.slane %v1030_v3, 1  ;;  %v1033_v9 = vrot.slane %v2363_v4, 4 }
 0x213   : > { %v907_v11 = vrot.slane %v850_v5, 4  ;;  %1528 = vrot.lane.b32.xlu0 %v850_v5, %s2040_s18  ;;  %1890 = vpow2.f32 %v995_v6  ;;  %v905_v12 = vrot.slane %v904_v7, 1 }
 0x214   : > { %v1887_v13 = vpop.eup %1886  ;;  %v2369_v54 = vadd.f32 %v1031_v8, %v1030_v3  ;;  %v1034_v14 = vadd.f32 %v2363_v4, %v1033_v9 }
 0x215   : > { %v1889_v15 = vpop.eup %1888  ;;  %v908_v17 = vmax.f32 %v850_v5, %v907_v11  ;;  %v1358_v18 = vmul.f32 0.6931472, %v1887_v13  ;;  %v906_v19 = vmax.f32 %v904_v7, %v905_v12 }
 0x216   : > { %1892 = vrcp.f32 %v2369_v54  ;;  %v1035_v20 = vrot.slane %v1034_v14, 2  ;;  %v1118_v21 = vmul.f32 %v1889_v15, %v2356_v59  ;;  %vm1123_vm2 = vweird.f32 %v1889_v15 }
 0x217   : > { %v909_v22 = vrot.slane %v908_v17, 2  ;;  %1894 = vlog2.f32 %v2369_v54  ;;  %v2375_v23 = vsub.f32 %v848_v52, %v906_v19  ;;  %v1389_v31 = vsub.f32 %v2334_v24, %v1358_v18  ;;  %vm1124_vm4 = vmor %vm1122_vm1, %vm1123_vm2 }
 0x218   : > { %v852_v26 = vpop.f32.mrf.mxu0  ;;  %v1036_v48 = vadd.f32 %v1035_v20, %v1034_v14  ;;  %v1119_v27 = vsub.f32 1.0, %v1118_v21  ;;  %v1141_v53 = vand.u32 2147483647, %v2369_v54  ;;  %v1143_v0 = vand.u32 2147483648, %v2369_v54 }
 0x219   : > { %v2380_v29 = vpop.eup %1890  ;;  %v2383_v30 = vadd.f32 %v2328_v10, %v852_v26  ;;  %v997_v32 = vmul.f32 1.442695, %v2375_v23  ;;  %v910_v34 = vmax.f32 %v908_v17, %v909_v22  ;;  %vm1137_vm6 = vweird.f32 %v2369_v54 }
 0x21a   : > { %v1037_v36 = vrot.slane %v1036_v48, 1  ;;  %v1039_v37 = vrot.slane %v2380_v29, 4  ;;  %v1120_v38 = vmul.f32 %v1889_v15, %v1119_v27  ;;  %vm1142_vm7 = vcmp.eq.f32.partialorder %v1141_v53, 8.507059e+37 }
 0x21b   : > { %v913_v39 = vrot.slane %v2383_v30, 4  ;;  %1530 = vrot.lane.b32.xlu1 %v2383_v30, %s2040_s18  ;;  %1437 = vrot.lane.b32.xlu0 %v1389_v31, %s2040_s18  ;;  %1896 = vpow2.f32 %v997_v32  ;;  %v911_v40 = vrot.slane %v910_v34, 1  ;;  %v1144_v20 = vor.u32 1.1754944e-38, %v1143_v0 }
 0x21c   : > { %v1893_v41 = vpop.eup %1892  ;;  %v2397_v42 = vadd.f32 %v1037_v36, %v1036_v48  ;;  %v1040_v43 = vadd.f32 %v2380_v29, %v1039_v37  ;;  %v1121_v44 = vadd.f32 %v1889_v15, %v1120_v38 }
 0x21d   : > { %v1895_v46 = vpop.eup %1894  ;;  %v914_v49 = vmax.f32 %v2383_v30, %v913_v39  ;;  %v912_v50 = vmax.f32 %v910_v34, %v911_v40  ;;  %v1133_v52 = vmul.f32 %v1893_v41, %v2369_v54  ;;  %vm1138_vm5 = vweird.f32 %v1893_v41 }
 0x21e   : > { %v1360_v16 = vmul.f32 0.6931472, %v1895_v46  ;;  %1898 = vrcp.f32 %v2397_v42  ;;  %v1041_v55 = vrot.slane %v1040_v43, 2  ;;  %v1125_v56 = vsel %vm1124_vm4, %v1889_v15, %v1121_v44  ;;  %vm1139_vm8 = vmor %vm1137_vm6, %vm1138_vm5 }
 0x21f   : > { %v915_v57 = vrot.slane %v914_v49, 2  ;;  %1900 = vlog2.f32 %v2397_v42  ;;  %v2410_v58 = vsub.f32 %v850_v5, %v912_v50  ;;  %v1130_v60 = vsel %vm2393_vm3, %v1129_v45, %v1125_v56 }
 0x220   : > { %v854_v61 = vpop.f32.mrf.mxu0  ;;  %v1042_v59 = vadd.f32 %v1041_v55, %v1040_v43  ;;  %v1131_v62 = vmul.f32 %v2341_v35, %v1130_v60  ;;  %v1134_v63 = vsub.f32 1.0, %v1133_v52  ;;  %v1390_v6 = vsub.f32 %v2339_v33, %v1360_v16 }
 0x221   : > { %v2416_v2 = vpop.eup %1896  ;;  %v2419_v3 = vadd.f32 %v2328_v10, %v854_v61  ;;  %v999_v5 = vmul.f32 1.442695, %v2410_v58  ;;  %v916_v7 = vmax.f32 %v914_v49, %v915_v57  ;;  %v1156_v26 = vand.u32 2147483647, %v2397_v42 }
 0x222   : > { %v1043_v8 = vrot.slane %v1042_v59, 1  ;;  %v1045_v9 = vrot.slane %v2416_v2, 4  ;;  %1405 = vst.msk [vmem:[%s2424_s22] sm:$0xff] %vm335_vm0, %v1131_v62  ;;  %v1135_v35 = vmul.f32 %v1893_v41, %v1134_v63  ;;  %vm1152_vm10 = vweird.f32 %v2397_v42 }
 0x223   : > { %v919_v11 = vrot.slane %v2419_v3, 4  ;;  %1532 = vrot.lane.b32.xlu2 %v2419_v3, %s2040_s18  ;;  %1439 = vrot.lane.b32.xlu0 %v1390_v6, %s2040_s18  ;;  %1902 = vpow2.f32 %v999_v5  ;;  %v917_v33 = vrot.slane %v916_v7, 1  ;;  %vm2472_vm11 = vcmp.eq.f32.partialorder %v1156_v26, 8.507059e+37 }
 0x224   : > { %v2433_v12 = vpop.eup %1898  ;;  %v2435_v13 = vadd.f32 %v1043_v8, %v1042_v59  ;;  %v1046_v14 = vadd.f32 %v2416_v2, %v1045_v9  ;;  %v1136_v15 = vadd.f32 %v1893_v41, %v1135_v35 }
 0x225   : > { %v1901_v17 = vpop.eup %1900  ;;  %v920_v18 = vmax.f32 %v2419_v3, %v919_v11  ;;  %v918_v19 = vmax.f32 %v916_v7, %v917_v33  ;;  %v1148_v21 = vmul.f32 %v2433_v12, %v2397_v42  ;;  %vm1153_vm9 = vweird.f32 %v2433_v12 }
 0x226   : > { %v1362_v22 = vmul.f32 0.6931472, %v1901_v17  ;;  %v1047_v54 = vrot.slane %v1046_v14, 2  ;;  %v1140_v25 = vsel %vm1139_vm8, %v1893_v41, %v1136_v15  ;;  %1904 = vlog2.f32 %v2435_v13  ;;  %vm2481_vm12 = vmor %vm1152_vm10, %vm1153_vm9 }
 0x227   : > { %v921_v48 = vrot.slane %v920_v18, 2  ;;  %v2445_v27 = vsub.f32 %v2383_v30, %v918_v19  ;;  %v1145_v28 = vsel %vm1142_vm7, %v1144_v20, %v1140_v25  ;;  %v1149_v37 = vsub.f32 1.0, %v1148_v21 }
 0x228   : > { %v857_v31 = vpop.f32.mrf.mxu0  ;;  %v1391_v32 = vsub.f32 %v2348_v47, %v1362_v22  ;;  %v1048_v34 = vadd.f32 %v1047_v54, %v1046_v14  ;;  %v1146_v36 = vmul.f32 %v2350_v51, %v1145_v28  ;;  %v1158_v30 = vand.u32 2147483648, %v2397_v42 }
 0x229   : > { %v2449_v38 = vpop.eup %1902  ;;  %v2452_v39 = vadd.f32 %v2328_v10, %v857_v31  ;;  %v1001_v40 = vmul.f32 1.442695, %v2445_v27  ;;  %v922_v24 = vmax.f32 %v920_v18, %v921_v48  ;;  %1906 = vrcp.f32 %v2435_v13 }
 0x22a   : > { %1441 = vrot.lane.b32.xlu1 %v1391_v32, %s2040_s18  ;;  %v1049_v41 = vrot.slane %v1048_v34, 1  ;;  %v1051_v47 = vrot.slane %v2449_v38, 4  ;;  %1406 = vst.msk [vmem:[%s2424_s22 + $0x8] sm:$0xff] %vm335_vm0, %v1146_v36  ;;  %v1150_v51 = vmul.f32 %v2433_v12, %v1149_v37  ;;  %v1159_v57 = vor.u32 1.1754944e-38, %v1158_v30 }
 0x22b   : > { %v925_v43 = vrot.slane %v2452_v39, 4  ;;  %1534 = vrot.lane.b32.xlu0 %v2452_v39, %s2040_s18  ;;  %1908 = vpow2.f32 %v1001_v40  ;;  %v923_v44 = vrot.slane %v922_v24, 1  ;;  %v1171_v42 = vand.u32 2147483647, %v2435_v13 }
 0x22c   : > { %v2465_v45 = vadd.f32 %v1049_v41, %v1048_v34  ;;  %v1052_v46 = vadd.f32 %v2449_v38, %v1051_v47  ;;  %v1151_v49 = vadd.f32 %v2433_v12, %v1150_v51  ;;  %v1905_v50 = vpop.eup %1904  ;;  %v1173_v7 = vand.u32 2147483648, %v2435_v13 }
 0x22d   : > { %v926_v52 = vmax.f32 %v2452_v39, %v925_v43  ;;  %v924_v53 = vmax.f32 %v922_v24, %v923_v44  ;;  %v1364_v55 = vmul.f32 0.6931472, %v1905_v50  ;;  %vm1167_vm2 = vweird.f32 %v2435_v13 }
 0x22e   : > { %1910 = vrcp.f32 %v2465_v45  ;;  %v1053_v56 = vrot.slane %v1052_v46, 2  ;;  %v1155_v5 = vsel %vm2481_vm12, %v2433_v12, %v1151_v49  ;;  %v1186_v11 = vand.u32 2147483647, %v2465_v45 }
 0x22f   : > { %v927_v60 = vrot.slane %v926_v52, 2  ;;  %1912 = vlog2.f32 %v2465_v45  ;;  %v2479_v61 = vsub.f32 %v2419_v3, %v924_v53  ;;  %v2486_v62 = vpop.eup %1906  ;;  %v1392_v0 = vsub.f32 %v2361_v1, %v1364_v55 }
 0x230   : > { %v859_v63 = vpop.f32.mrf.mxu0  ;;  %v1054_v6 = vadd.f32 %v1053_v56, %v1052_v46  ;;  %v1188_v14 = vand.u32 2147483648, %v2465_v45  ;;  %v1160_v12 = vsel %vm2472_vm11, %v1159_v57, %v1155_v5  ;;  %vm1182_vm13 = vweird.f32 %v2465_v45 }
 0x231   : > { %v2493_v3 = vpop.eup %1908  ;;  %v2496_v8 = vadd.f32 %v2328_v10, %v859_v63  ;;  %v1003_v9 = vmul.f32 1.442695, %v2479_v61  ;;  %v928_v35 = vmax.f32 %v926_v52, %v927_v60  ;;  %v1161_v18 = vmul.f32 %v2363_v4, %v1160_v12 }
 0x232   : > { %1443 = vrot.lane.b32.xlu1 %v1392_v0, %s2040_s18  ;;  %v1055_v1 = vrot.slane %v1054_v6, 1  ;;  %v1057_v33 = vrot.slane %v2493_v3, 4  ;;  %v1163_v22 = vmul.f32 %v2486_v62, %v2435_v13  ;;  %vm2515_vm14 = vcmp.eq.f32.partialorder %v1186_v11, 8.507059e+37 }
 0x233   : > { %v931_v15 = vrot.slane %v2496_v8, 4  ;;  %1914 = vpow2.f32 %v1003_v9  ;;  %v929_v17 = vrot.slane %v928_v35, 1  ;;  %1407 = vst.msk [vmem:[%s2424_s22 + $0x10] sm:$0xff] %vm335_vm0, %v1161_v18  ;;  %v1189_v32 = vor.u32 1.1754944e-38, %v1188_v14 }
 0x234   : > { %v1911_v19 = vpop.eup %1910  ;;  %v2507_v20 = vadd.f32 %v1055_v1, %v1054_v6  ;;  %v1058_v21 = vadd.f32 %v2493_v3, %v1057_v33  ;;  %vm1168_vm15 = vweird.f32 %v2486_v62  ;;  %v1164_v41 = vsub.f32 1.0, %v1163_v22 }
 0x235   : > { %v1913_v54 = vpop.eup %1912  ;;  %v932_v25 = vmax.f32 %v2496_v8, %v931_v15  ;;  %v930_v26 = vmax.f32 %v928_v35, %v929_v17  ;;  %v1178_v48 = vmul.f32 %v1911_v19, %v2465_v45  ;;  %vm1183_vm1 = vweird.f32 %v1911_v19  ;;  %vm1169_vm8 = vmor %vm1167_vm2, %vm1168_vm15 }
 0x236   : > { %v1366_v4 = vmul.f32 0.6931472, %v1913_v54  ;;  %1916 = vrcp.f32 %v2507_v20  ;;  %v1059_v31 = vrot.slane %v1058_v21, 2  ;;  %v1201_v49 = vand.u32 2147483647, %v2507_v20  ;;  %vm1184_vm4 = vmor %vm1182_vm13, %vm1183_vm1 }
 0x237   : > { %v933_v34 = vrot.slane %v932_v25, 2  ;;  %1918 = vlog2.f32 %v2507_v20  ;;  %v2524_v36 = vsub.f32 %v2452_v39, %v930_v26  ;;  %v1179_v37 = vsub.f32 1.0, %v1178_v48 }
 0x238   : > { %v862_v40 = vpop.f32.mrf.mxu0  ;;  %v1393_v24 = vsub.f32 %v2375_v23, %v1366_v4  ;;  %v1060_v30 = vadd.f32 %v1059_v31, %v1058_v21  ;;  %v1203_v50 = vand.u32 2147483648, %v2507_v20  ;;  %vm2542_vm3 = vcmp.eq.f32.partialorder %v1171_v42, 8.507059e+37 }
 0x239   : > { %v2528_v47 = vpop.eup %1914  ;;  %v2531_v51 = vadd.f32 %v2328_v10, %v862_v40  ;;  %v1005_v43 = vmul.f32 1.442695, %v2524_v36  ;;  %v934_v44 = vmax.f32 %v932_v25, %v933_v34  ;;  %v1180_v46 = vmul.f32 %v1911_v19, %v1179_v37 }
 0x23a   : > { %1445 = vrot.lane.b32.xlu2 %v1393_v24, %s2040_s18  ;;  %1536 = vrot.lane.b32.xlu1 %v2496_v8, %s2040_s18  ;;  %v1061_v23 = vrot.slane %v1060_v30, 1  ;;  %v1063_v39 = vrot.slane %v2528_v47, 4  ;;  %vm1197_vm5 = vweird.f32 %v2507_v20  ;;  %v1165_v59 = vmul.f32 %v2486_v62, %v1164_v41 }
 0x23b   : > { %v937_v52 = vrot.slane %v2531_v51, 4  ;;  %1920 = vpow2.f32 %v1005_v43  ;;  %v935_v53 = vrot.slane %v934_v44, 1  ;;  %v1181_v16 = vadd.f32 %v1911_v19, %v1180_v46 }
 0x23c   : > { %v1917_v56 = vpop.eup %1916  ;;  %v2546_v57 = vadd.f32 %v1061_v23, %v1060_v30  ;;  %v1064_v60 = vadd.f32 %v2528_v47, %v1063_v39  ;;  %vm2559_vm6 = vcmp.eq.f32.partialorder %v1201_v49, 8.507059e+37  ;;  %v1204_v11 = vor.u32 1.1754944e-38, %v1203_v50 }
 0x23d   : > { %v1919_v63 = vpop.eup %1918  ;;  %v938_v0 = vmax.f32 %v2531_v51, %v937_v52  ;;  %v936_v42 = vmax.f32 %v934_v44, %v935_v53  ;;  %v1185_v6 = vsel %vm1184_vm4, %v1911_v19, %v1181_v16  ;;  %v1193_v5 = vmul.f32 %v1917_v56, %v2507_v20 }
 0x23e   : > { %1922 = vrcp.f32 %v2546_v57  ;;  %v1065_v9 = vrot.slane %v1064_v60, 2  ;;  %v1190_v35 = vsel %vm2515_vm14, %v1189_v32, %v1185_v6  ;;  %v1368_v15 = vmul.f32 0.6931472, %v1919_v63 }
 0x23f   : > { %v939_v1 = vrot.slane %v938_v0, 2  ;;  %1924 = vlog2.f32 %v2546_v57  ;;  %v2565_v33 = vsub.f32 %v2496_v8, %v936_v42  ;;  %v1191_v14 = vmul.f32 %v2416_v2, %v1190_v35 }
 0x240   : > { %v864_v12 = vpop.f32.mrf.mxu0  ;;  %v1066_v17 = vadd.f32 %v1065_v9, %v1064_v60  ;;  %v1194_v18 = vsub.f32 1.0, %v1193_v5  ;;  %v1174_v19 = vor.u32 1.1754944e-38, %v1173_v7  ;;  %v1166_v8 = vadd.f32 %v2486_v62, %v1165_v59 }
 0x241   : > { %v2570_v21 = vpop.eup %1920  ;;  %v2573_v22 = vadd.f32 %v2328_v10, %v864_v12  ;;  %v1007_v54 = vmul.f32 1.442695, %v2565_v33  ;;  %v940_v25 = vmax.f32 %v938_v0, %v939_v1  ;;  %1409 = vst.msk [vmem:[%s2424_s22 + $0x20] sm:$0xff] %vm335_vm0, %v1191_v14  ;;  %vm1198_vm7 = vweird.f32 %v1917_v56 }
 0x242   : > { %1538 = vrot.lane.b32.xlu2 %v2531_v51, %s2040_s18  ;;  %v1067_v2 = vrot.slane %v1066_v17, 1  ;;  %v1069_v26 = vrot.slane %v2570_v21, 4  ;;  %v1195_v48 = vmul.f32 %v1917_v56, %v1194_v18  ;;  %v1170_v4 = vsel %vm1169_vm8, %v2486_v62, %v1166_v8  ;;  %vm1199_vm9 = vmor %vm1197_vm5, %vm1198_vm7 }
 0x243   : > { %v943_v7 = vrot.slane %v2573_v22, 4  ;;  %1540 = vrot.lane.b32.xlu0 %v2573_v22, %s2040_s18  ;;  %1926 = vpow2.f32 %v1007_v54  ;;  %v941_v28 = vrot.slane %v940_v25, 1  ;;  %v1175_v13 = vsel %vm2542_vm3, %v1174_v19, %v1170_v4 }
 0x244   : > { %v2590_v31 = vpop.eup %1922  ;;  %v2592_v32 = vadd.f32 %v1067_v2, %v1066_v17  ;;  %v1070_v34 = vadd.f32 %v2570_v21, %v1069_v26  ;;  %v1196_v37 = vadd.f32 %v1917_v56, %v1195_v48  ;;  %v1176_v62 = vmul.f32 %v2380_v29, %v1175_v13 }
 0x245   : > { %v1925_v40 = vpop.eup %1924  ;;  %v944_v24 = vmax.f32 %v2573_v22, %v943_v7  ;;  %v942_v30 = vmax.f32 %v940_v25, %v941_v28  ;;  %v1208_v41 = vmul.f32 %v2590_v31, %v2546_v57  ;;  %v1394_v49 = vsub.f32 %v2410_v58, %v1368_v15 }
 0x246   : > { %v1370_v43 = vmul.f32 0.6931472, %v1925_v40  ;;  %1928 = vrcp.f32 %v2592_v32  ;;  %v1071_v44 = vrot.slane %v1070_v34, 2  ;;  %v1200_v46 = vsel %vm1199_vm9, %v1917_v56, %v1196_v37  ;;  %1408 = vst.msk [vmem:[%s2424_s22 + $0x18] sm:$0xff] %vm335_vm0, %v1176_v62 }
 0x247   : > { %v945_v23 = vrot.slane %v944_v24, 2  ;;  %1930 = vlog2.f32 %v2592_v32  ;;  %v2607_v39 = vsub.f32 %v2531_v51, %v942_v30  ;;  %v1205_v20 = vsel %vm2559_vm6, %v1204_v11, %v1200_v46 }
 0x248   : > { %v867_v29 = vpop.f32.mrf.mxu0  ;;  %v1072_v50 = vadd.f32 %v1071_v44, %v1070_v34  ;;  %v1206_v52 = vmul.f32 %v2449_v38, %v1205_v20  ;;  %v1209_v53 = vsub.f32 1.0, %v1208_v41  ;;  %v1395_v51 = vsub.f32 %v2445_v27, %v1370_v43 }
 0x249   : > { %v2615_v16 = vpop.eup %1926  ;;  %v2618_v55 = vadd.f32 %v2328_v10, %v867_v29  ;;  %v1009_v56 = vmul.f32 1.442695, %v2607_v39  ;;  %v946_v60 = vmax.f32 %v944_v24, %v945_v23  ;;  %v1216_v38 = vand.u32 2147483647, %v2546_v57 }
 0x24a   : > { %1447 = vrot.lane.b32.xlu2 %v1394_v49, %s2040_s18  ;;  %v1073_v59 = vrot.slane %v1072_v50, 1  ;;  %v1075_v63 = vrot.slane %v2615_v16, 4  ;;  %1410 = vst.msk [vmem:[%s2424_s22 + $0x28] sm:$0xff] %vm335_vm0, %v1206_v52  ;;  %v1210_v58 = vmul.f32 %v2590_v31, %v1209_v53  ;;  %v1218_v42 = vand.u32 2147483648, %v2546_v57 }
 0x24b   : > { %v949_v0 = vrot.slane %v2618_v55, 4  ;;  %1542 = vrot.lane.b32.xlu1 %v2618_v55, %s2040_s18  ;;  %1449 = vrot.lane.b32.xlu0 %v1395_v51, %s2040_s18  ;;  %1932 = vpow2.f32 %v1009_v56  ;;  %v947_v27 = vrot.slane %v946_v60, 1  ;;  %vm1213_vm10 = vweird.f32 %v2590_v31 }
 0x24c   : > { %v2633_v6 = vpop.eup %1928  ;;  %v2635_v5 = vadd.f32 %v1073_v59, %v1072_v50  ;;  %v1076_v9 = vadd.f32 %v2615_v16, %v1075_v63  ;;  %v1211_v35 = vadd.f32 %v2590_v31, %v1210_v58  ;;  %vm1212_vm11 = vweird.f32 %v2546_v57 }
 0x24d   : > { %v1931_v45 = vpop.eup %1930  ;;  %v950_v11 = vmax.f32 %v2618_v55, %v949_v0  ;;  %v948_v1 = vmax.f32 %v946_v60, %v947_v27  ;;  %vm2642_vm12 = vcmp.eq.f32.partialorder %v1216_v38, 8.507059e+37  ;;  %v1219_v17 = vor.u32 1.1754944e-38, %v1218_v42  ;;  %vm1214_vm13 = vmor %vm1212_vm11, %vm1213_vm10 }
 0x24e   : > { %v1372_v12 = vmul.f32 0.6931472, %v1931_v45  ;;  %1934 = vrcp.f32 %v2635_v5  ;;  %v1077_v15 = vrot.slane %v1076_v9, 2  ;;  %v1223_v54 = vmul.f32 %v2633_v6, %v2592_v32 }
 0x24f   : > { %v951_v18 = vrot.slane %v950_v11, 2  ;;  %1936 = vlog2.f32 %v2635_v5  ;;  %v2649_v19 = vsub.f32 %v2573_v22, %v948_v1  ;;  %v1246_v8 = vand.u32 2147483647, %v2635_v5 }
 0x250   : > { %v869_v57 = vpop.f32.mrf.mxu0  ;;  %v1078_v25 = vadd.f32 %v1077_v15, %v1076_v9  ;;  %v1248_v2 = vand.u32 2147483648, %v2635_v5  ;;  %v1215_v26 = vsel %vm1214_vm13, %v2590_v31, %v1211_v35  ;;  %v1396_v22 = vsub.f32 %v2479_v61, %v1372_v12 }
 0x251   : > { %v2656_v48 = vpop.eup %1932  ;;  %v2659_v7 = vadd.f32 %v2328_v10, %v869_v57  ;;  %v1011_v28 = vmul.f32 1.442695, %v2649_v19  ;;  %v952_v4 = vmax.f32 %v950_v11, %v951_v18  ;;  %v1220_v13 = vsel %vm2642_vm12, %v1219_v17, %v1215_v26 }
 0x252   : > { %v1079_v34 = vrot.slane %v1078_v25, 1  ;;  %v1081_v37 = vrot.slane %v2656_v48, 4  ;;  %vm1242_vm14 = vweird.f32 %v2635_v5  ;;  %v1221_v61 = vmul.f32 %v2493_v3, %v1220_v13 }
 0x253   : > { %v955_v40 = vrot.slane %v2659_v7, 4  ;;  %1451 = vrot.lane.b32.xlu1 %v1396_v22, %s2040_s18  ;;  %1938 = vpow2.f32 %v1011_v28  ;;  %v953_v31 = vrot.slane %v952_v4, 1  ;;  %v1249_v41 = vor.u32 1.1754944e-38, %v1248_v2 }
 0x254   : > { %v1935_v24 = vpop.eup %1934  ;;  %v2670_v30 = vadd.f32 %v1079_v34, %v1078_v25  ;;  %v1082_v62 = vadd.f32 %v2656_v48, %v1081_v37  ;;  %v1224_v43 = vsub.f32 1.0, %v1223_v54  ;;  %vm2675_vm1 = vcmp.eq.f32.partialorder %v1246_v8, 8.507059e+37  ;;  %1411 = vst.msk [vmem:[%s2424_s22 + $0x30] sm:$0xff] %vm335_vm0, %v1221_v61 }
 0x255   : > { %v1937_v44 = vpop.eup %1936  ;;  %v956_v46 = vmax.f32 %v2659_v7, %v955_v40  ;;  %v954_v23 = vmax.f32 %v952_v4, %v953_v31  ;;  %v1238_v20 = vmul.f32 %v1935_v24, %v2635_v5  ;;  %vm1243_vm15 = vweird.f32 %v1935_v24 }
 0x256   : > { %v1374_v3 = vmul.f32 0.6931472, %v1937_v44  ;;  %1940 = vrcp.f32 %v2670_v30  ;;  %v1083_v49 = vrot.slane %v1082_v62, 2  ;;  %v1225_v50 = vmul.f32 %v2633_v6, %v1224_v43  ;;  %vm1244_vm5 = vmor %vm1242_vm14, %vm1243_vm15 }
 0x257   : > { %v957_v52 = vrot.slane %v956_v46, 2  ;;  %1942 = vlog2.f32 %v2670_v30  ;;  %v2685_v53 = vsub.f32 %v2618_v55, %v954_v23  ;;  %v1239_v51 = vsub.f32 1.0, %v1238_v20 }
 0x258   : > { %v872_v56 = vpop.f32.mrf.mxu0  ;;  %v1397_v60 = vsub.f32 %v2524_v36, %v1374_v3  ;;  %v1084_v59 = vadd.f32 %v1083_v49, %v1082_v62  ;;  %v1226_v63 = vadd.f32 %v2633_v6, %v1225_v50  ;;  %vm1228_vm2 = vweird.f32 %v2633_v6 }
 0x259   : > { %v2690_v58 = vpop.eup %1938  ;;  %v2693_v38 = vadd.f32 %v2328_v10, %v872_v56  ;;  %v1013_v0 = vmul.f32 1.442695, %v2685_v53  ;;  %v958_v27 = vmax.f32 %v956_v46, %v957_v52  ;;  %v1240_v42 = vmul.f32 %v1935_v24, %v1239_v51 }
 0x25a   : > { %1453 = vrot.lane.b32.xlu2 %v1397_v60, %s2040_s18  ;;  %v1085_v55 = vrot.slane %v1084_v59, 1  ;;  %v1087_v9 = vrot.slane %v2690_v58, 4  ;;  %vm1227_vm3 = vweird.f32 %v2592_v32  ;;  %v1231_v36 = vand.u32 2147483647, %v2592_v32 }
 0x25b   : > { %v961_v35 = vrot.slane %v2693_v38, 4  ;;  %1944 = vpow2.f32 %v1013_v0  ;;  %v959_v45 = vrot.slane %v958_v27, 1  ;;  %v1241_v11 = vadd.f32 %v1935_v24, %v1240_v42  ;;  %vm2703_vm4 = vmor %vm1227_vm3, %vm1228_vm2 }
 0x25c   : > { %v2707_v14 = vpop.eup %1940  ;;  %v2709_v12 = vadd.f32 %v1085_v55, %v1084_v59  ;;  %v1088_v15 = vadd.f32 %v2690_v58, %v1087_v9  ;;  %v1230_v17 = vsel %vm2703_vm4, %v2633_v6, %v1226_v63  ;;  %v1233_v18 = vand.u32 2147483648, %v2592_v32 }
 0x25d   : > { %v1943_v54 = vpop.eup %1942  ;;  %v962_v57 = vmax.f32 %v2693_v38, %v961_v35  ;;  %v960_v25 = vmax.f32 %v958_v27, %v959_v45  ;;  %v1245_v8 = vsel %vm1244_vm5, %v1935_v24, %v1241_v11  ;;  %v1253_v2 = vmul.f32 %v2707_v14, %v2670_v30 }
 0x25e   : > { %v1376_v26 = vmul.f32 0.6931472, %v1943_v54  ;;  %v1089_v22 = vrot.slane %v1088_v15, 2  ;;  %v1250_v5 = vsel %vm2675_vm1, %v1249_v41, %v1245_v8  ;;  %vm2724_vm6 = vcmp.eq.f32.partialorder %v1231_v36, 8.507059e+37 }
 0x25f   : > { %v963_v6 = vrot.slane %v962_v57, 2  ;;  %1946 = vlog2.f32 %v2709_v12  ;;  %v2730_v32 = vsub.f32 %v2659_v7, %v960_v25  ;;  %v1251_v4 = vmul.f32 %v2570_v21, %v1250_v5 }
 0x260   : > { %v874_v34 = vpop.f32.mrf.mxu0  ;;  %v1398_v37 = vsub.f32 %v2565_v33, %v1376_v26  ;;  %v1090_v13 = vadd.f32 %v1089_v22, %v1088_v15  ;;  %v1234_v40 = vor.u32 1.1754944e-38, %v1233_v18  ;;  %v1254_v31 = vsub.f32 1.0, %v1253_v2 }
 0x261   : > { %v2734_v61 = vpop.eup %1944  ;;  %v2737_v24 = vadd.f32 %v2328_v10, %v874_v34  ;;  %1948 = vrcp.f32 %v2709_v12  ;;  %v1015_v62 = vmul.f32 1.442695, %v2730_v32  ;;  %v964_v41 = vmax.f32 %v962_v57, %v963_v6  ;;  %1413 = vst.msk [vmem:[%s2424_s22 + $0x40] sm:$0xff] %vm335_vm0, %v1251_v4 }
 0x262   : > { %1455 = vrot.lane.b32.xlu0 %v1398_v37, %s2040_s18  ;;  %v1091_v21 = vrot.slane %v1090_v13, 1  ;;  %v1093_v33 = vrot.slane %v2734_v61, 4  ;;  %v1235_v43 = vsel %vm2724_vm6, %v1234_v40, %v1230_v17  ;;  %v1255_v44 = vmul.f32 %v2707_v14, %v1254_v31 }
 0x263   : > { %v967_v10 = vrot.slane %v2737_v24, 4  ;;  %1950 = vpow2.f32 %v1015_v62  ;;  %v965_v46 = vrot.slane %v964_v41, 1  ;;  %v1236_v23 = vmul.f32 %v2528_v47, %v1235_v43 }
 0x264   : > { %v2750_v20 = vadd.f32 %v1091_v21, %v1090_v13  ;;  %v1094_v29 = vadd.f32 %v2734_v61, %v1093_v33  ;;  %vm1257_vm7 = vweird.f32 %v2670_v30  ;;  %v1256_v52 = vadd.f32 %v2707_v14, %v1255_v44 }
 0x265   : > { %v1947_v3 = vpop.eup %1946  ;;  %v968_v49 = vmax.f32 %v2737_v24, %v967_v10  ;;  %v966_v50 = vmax.f32 %v964_v41, %v965_v46  ;;  %1412 = vst.msk [vmem:[%s2424_s22 + $0x38] sm:$0xff] %vm335_vm0, %v1236_v23  ;;  %vm1258_vm8 = vweird.f32 %v2707_v14  ;;  %v1263_v56 = vand.u32 2147483648, %v2670_v30 }
 0x266   : > { %v1378_v51 = vmul.f32 0.6931472, %v1947_v3  ;;  %1952 = vrcp.f32 %v2750_v20  ;;  %v1095_v47 = vrot.slane %v1094_v29, 2  ;;  %v1261_v0 = vand.u32 2147483647, %v2670_v30  ;;  %vm2771_vm9 = vmor %vm1257_vm7, %vm1258_vm8 }
 0x267   : > { %v2761_v60 = vpop.eup %1948  ;;  %v969_v59 = vrot.slane %v968_v49, 2  ;;  %1954 = vlog2.f32 %v2750_v20  ;;  %v2765_v63 = vsub.f32 %v2693_v38, %v966_v50  ;;  %v1260_v45 = vsel %vm2771_vm9, %v2707_v14, %v1256_v52 }
 0x268   : > { %v1399_v27 = vsub.f32 %v2607_v39, %v1378_v51  ;;  %v1096_v42 = vadd.f32 %v1095_v47, %v1094_v29  ;;  %v1264_v1 = vor.u32 1.1754944e-38, %v1263_v56  ;;  %vm1262_vm10 = vcmp.eq.f32.partialorder %v1261_v0, 8.507059e+37 }
 0x269   : > { %v2775_v9 = vpop.eup %1950  ;;  %v1017_v36 = vmul.f32 1.442695, %v2765_v63  ;;  %v970_v35 = vmax.f32 %v968_v49, %v969_v59  ;;  %v1268_v57 = vmul.f32 %v2761_v60, %v2709_v12  ;;  %vm1287_vm11 = vweird.f32 %v2750_v20 }
 0x26a   : > { %1457 = vrot.lane.b32.xlu1 %v1399_v27, %s2040_s18  ;;  %v1097_v11 = vrot.slane %v1096_v42, 1  ;;  %v1099_v39 = vrot.slane %v2775_v9, 4  ;;  %v1265_v54 = vsel %vm1262_vm10, %v1264_v1, %v1260_v45  ;;  %v1291_v2 = vand.u32 2147483647, %v2750_v20 }
 0x26b   : > { %1956 = vpow2.f32 %v1017_v36  ;;  %v971_v30 = vrot.slane %v970_v35, 1  ;;  %v1293_v5 = vand.u32 2147483648, %v2750_v20  ;;  %v1266_v4 = vmul.f32 %v2615_v16, %v1265_v54 }
 0x26c   : > { %v1953_v15 = vpop.eup %1952  ;;  %v2783_v17 = vadd.f32 %v1097_v11, %v1096_v42  ;;  %v1100_v18 = vadd.f32 %v2775_v9, %v1099_v39  ;;  %v1269_v13 = vsub.f32 1.0, %v1268_v57  ;;  %v1276_v41 = vand.u32 2147483647, %v2709_v12 }
 0x26d   : > { %v1955_v25 = vpop.eup %1954  ;;  %v972_v14 = vmax.f32 %v970_v35, %v971_v30  ;;  %v1283_v8 = vmul.f32 %v1953_v15, %v2750_v20  ;;  %vm1288_vm12 = vweird.f32 %v1953_v15  ;;  %1414 = vst.msk [vmem:[%s2424_s22 + $0x48] sm:$0xff] %vm335_vm0, %v1266_v4  ;;  %v1278_v21 = vand.u32 2147483648, %v2709_v12  ;;  %v2844_v30 = vpop.permute.xlu2 %1520 }
 0x26e   : > { %v1380_v26 = vmul.f32 0.6931472, %v1955_v25  ;;  %1958 = vrcp.f32 %v2783_v17  ;;  %v1101_v22 = vrot.slane %v1100_v18, 2  ;;  %vm2808_vm13 = vcmp.eq.f32.partialorder %v1291_v2, 8.507059e+37  ;;  %vm1289_vm15 = vmor %vm1287_vm11, %vm1288_vm12  ;;  %v2849_v54 = vpop.permute.xlu0 %1522 }
 0x26f   : > { %1960 = vlog2.f32 %v2783_v17  ;;  %v2795_v28 = vsub.f32 %v2737_v24, %v972_v14  ;;  %v1284_v6 = vsub.f32 1.0, %v1283_v8  ;;  %v1270_v43 = vmul.f32 %v2761_v60, %v1269_v13 }
 0x270   : > { %v1400_v34 = vsub.f32 %v2649_v19, %v1380_v26  ;;  %v1102_v37 = vadd.f32 %v1101_v22, %v1100_v18  ;;  %v1294_v10 = vor.u32 1.1754944e-38, %v1293_v5  ;;  %vm1273_vm14 = vweird.f32 %v2761_v60 }
 0x271   : > { %v2799_v40 = vpop.eup %1956  ;;  %v1019_v31 = vmul.f32 1.442695, %v2795_v28  ;;  %v1285_v62 = vmul.f32 %v1953_v15, %v1284_v6  ;;  %v1271_v3 = vadd.f32 %v2761_v60, %v1270_v43  ;;  %vm1272_vm1 = vweird.f32 %v2709_v12 }
 0x272   : > { %1459 = vrot.lane.b32.xlu2 %v1400_v34, %s2040_s18  ;;  %v1103_v33 = vrot.slane %v1102_v37, 1  ;;  %v1105_v16 = vrot.slane %v2799_v40, 4  ;;  %vm1277_vm2 = vcmp.eq.f32.partialorder %v1276_v41, 8.507059e+37  ;;  %v1279_v52 = vor.u32 1.1754944e-38, %v1278_v21  ;;  %vm1274_vm3 = vmor %vm1272_vm1, %vm1273_vm14 }
 0x273   : > { %1962 = vpow2.f32 %v1019_v31  ;;  %v1286_v44 = vadd.f32 %v1953_v15, %v1285_v62  ;;  %v1275_v20 = vsel %vm1274_vm3, %v2761_v60, %v1271_v3  ;;  %v1308_v11 = vand.u32 2147483648, %v2783_v17  ;;  %v1519_v62 = vpop.permute.xlu1 %1518 }
 0x274   : > { %v1959_v46 = vpop.eup %1958  ;;  %v2814_v23 = vadd.f32 %v1103_v33, %v1102_v37  ;;  %v1106_v29 = vadd.f32 %v2799_v40, %v1105_v16  ;;  %v1280_v55 = vsel %vm1277_vm2, %v1279_v52, %v1275_v20  ;;  %v1306_v39 = vand.u32 2147483647, %v2783_v17 }
 0x275   : > { %v1961_v49 = vpop.eup %1960  ;;  %v1290_v50 = vsel %vm1289_vm15, %v1953_v15, %v1286_v44  ;;  %v1298_v51 = vmul.f32 %v1959_v46, %v2783_v17  ;;  %v1281_v35 = vmul.f32 %v2656_v48, %v1280_v55  ;;  %vm1303_vm4 = vweird.f32 %v1959_v46  ;;  %v2861_v41 = vpop.permute.xlu2 %1526 }
 0x276   : > { %v1382_v47 = vmul.f32 0.6931472, %v1961_v49  ;;  %1964 = vrcp.f32 %v2814_v23  ;;  %v1107_v56 = vrot.slane %v1106_v29, 2  ;;  %v1295_v59 = vsel %vm2808_vm13, %v1294_v10, %v1290_v50 }
 0x277   : > { %1966 = vlog2.f32 %v2814_v23  ;;  %v1296_v12 = vmul.f32 %v2690_v58, %v1295_v59  ;;  %v1299_v0 = vsub.f32 1.0, %v1298_v51  ;;  %1415 = vst.msk [vmem:[%s2424_s22 + $0x50] sm:$0xff] %vm335_vm0, %v1281_v35  ;;  %vm1302_vm5 = vweird.f32 %v2783_v17 }
 0x278   : > { %v1401_v27 = vsub.f32 %v2685_v53, %v1382_v47  ;;  %v1108_v42 = vadd.f32 %v1107_v56, %v1106_v29  ;;  %vm1304_vm6 = vmor %vm1302_vm5, %vm1303_vm4  ;;  %v1309_v25 = vor.u32 1.1754944e-38, %v1308_v11  ;;  %vm1307_vm7 = vcmp.eq.f32.partialorder %v1306_v39, 8.507059e+37 }
 0x279   : > { %v2832_v36 = vpop.eup %1962  ;;  %1416 = vst.msk [vmem:[%s2424_s22 + $0x58] sm:$0xff] %vm335_vm0, %v1296_v12  ;;  %v1300_v45 = vmul.f32 %v1959_v46, %v1299_v0  ;;  %v1323_v4 = vand.u32 2147483648, %v2814_v23  ;;  %v1321_v13 = vand.u32 2147483647, %v2814_v23  ;;  %vm1317_vm9 = vweird.f32 %v2814_v23 }
 0x27a   : > { %1461 = vrot.lane.b32.xlu0 %v1401_v27, %s2040_s18  ;;  %v1109_v58 = vrot.slane %v1108_v42, 1  ;;  %v1111_v60 = vrot.slane %v2832_v36, 4  ;;  %vm1485_vm13 = vcmask 523520   ;;  %vm1566_vm15 = vcmask 531968  }
 0x27b   : > { %v1301_v53 = vadd.f32 %v1959_v46, %v1300_v45  ;;  %v1324_v19 = vor.u32 1.1754944e-38, %v1323_v4  ;;  %vm1322_vm11 = vcmp.eq.f32.partialorder %v1321_v13, 8.507059e+37  ;;  %v1525_v51 = vpop.permute.xlu1 %1524 }
 0x27c   : > { %v1965_v1 = vpop.eup %1964  ;;  %v2846_v48 = vadd.f32 %v1109_v58, %v1108_v42  ;;  %v1112_v15 = vadd.f32 %v2832_v36, %v1111_v60 }
 0x27d   : > { %v1967_v18 = vpop.eup %1966  ;;  %v1305_v57 = vsel %vm1304_vm6, %v1959_v46, %v1301_v53  ;;  %v1313_v14 = vmul.f32 %v1965_v1, %v2814_v23  ;;  %vm1318_vm8 = vweird.f32 %v1965_v1 }
 0x27e   : > { %v1384_v8 = vmul.f32 0.6931472, %v1967_v18  ;;  %1968 = vrcp.f32 %v2846_v48  ;;  %v1113_v17 = vrot.slane %v1112_v15, 2  ;;  %v1310_v2 = vsel %vm1307_vm7, %v1309_v25, %v1305_v57  ;;  %vm1319_vm10 = vmor %vm1317_vm9, %vm1318_vm8 }
 0x27f   : > { %1970 = vlog2.f32 %v2846_v48  ;;  %v1311_v5 = vmul.f32 %v2734_v61, %v1310_v2  ;;  %v1314_v6 = vsub.f32 1.0, %v1313_v14  ;;  %v1338_v3 = vand.u32 2147483648, %v2846_v48 }
 0x280   : > { %v1402_v26 = vsub.f32 %v2730_v32, %v1384_v8  ;;  %v1114_v22 = vadd.f32 %v1113_v17, %v1112_v15  ;;  %v1336_v50 = vand.u32 2147483647, %v2846_v48  ;;  %vm1332_vm14 = vweird.f32 %v2846_v48 }
 0x281   : > { %1417 = vst.msk [vmem:[%s2424_s22 + $0x60] sm:$0xff] %vm335_vm0, %v1311_v5  ;;  %v1315_v37 = vmul.f32 %v1965_v1, %v1314_v6  ;;  %v1339_v47 = vor.u32 1.1754944e-38, %v1338_v3 }
 0x282   : > { %1463 = vrot.lane.b32.xlu1 %v1402_v26, %s2040_s18  ;;  %v1115_v34 = vrot.slane %v1114_v22, 1  ;;  %vm1337_vm2 = vcmp.eq.f32.partialorder %v1336_v50, 8.507059e+37 }
 0x283   : > { %v1316_v21 = vadd.f32 %v1965_v1, %v1315_v37 }
 0x284   : > { %v1969_v31 = vpop.eup %1968  ;;  %v1116_v32 = vadd.f32 %v1115_v34, %v1114_v22 }
 0x285   : > { %v1971_v61 = vpop.eup %1970  ;;  %v2864_v33 = vpop.permute.xlu0 %1528  ;;  %v1328_v16 = vmul.f32 %v1969_v31, %v2846_v48  ;;  %v1320_v44 = vsel %vm1319_vm10, %v1965_v1, %v1316_v21  ;;  %vm1333_vm12 = vweird.f32 %v1969_v31 }
 0x286   : > { %v1386_v43 = vmul.f32 0.6931472, %v1971_v61  ;;  %1972 = vrcp.f32 %v1116_v32  ;;  %v1325_v46 = vsel %vm1322_vm11, %v1324_v19, %v1320_v44  ;;  %vm1334_vm1 = vmor %vm1332_vm14, %vm1333_vm12  ;;  %v1353_v35 = vand.u32 2147483648, %v1116_v32 }
 0x287   : > { %1974 = vlog2.f32 %v1116_v32  ;;  %v1329_v10 = vsub.f32 1.0, %v1328_v16  ;;  %v1326_v23 = vmul.f32 %v2775_v9, %v1325_v46  ;;  %v1533_v9 = vpop.permute.xlu2 %1532  ;;  %v1351_v11 = vand.u32 2147483647, %v1116_v32 }
 0x288   : > { %v1403_v29 = vsub.f32 %v2765_v63, %v1386_v43  ;;  %vm1347_vm4 = vweird.f32 %v1116_v32 }
 0x289   : > { %v1330_v49 = vmul.f32 %v1969_v31, %v1329_v10  ;;  %1418 = vst.msk [vmem:[%s2424_s22 + $0x68] sm:$0xff] %vm335_vm0, %v1326_v23  ;;  %vm1352_vm6 = vcmp.eq.f32.partialorder %v1351_v11, 8.507059e+37 }
 0x28a   : > { %1465 = vrot.lane.b32.xlu2 %v1403_v29, %s2040_s18  ;;  %1548 = vrot.lane.b32.xlu1 %v2737_v24, %s2040_s18 }
 0x28b   : > { %v1331_v52 = vadd.f32 %v1969_v31, %v1330_v49 }
 0x28c   : > { %v1973_v63 = vpop.eup %1972 }
 0x28d   : > { %v1975_v56 = vpop.eup %1974  ;;  %v1438_v59 = vpop.permute.xlu0 %1437  ;;  %v1335_v12 = vsel %vm1334_vm1, %v1969_v31, %v1331_v52  ;;  %v1343_v24 = vmul.f32 %v1973_v63, %v1116_v32  ;;  %vm1348_vm3 = vweird.f32 %v1973_v63 }
 0x28e   : > { %1486 = vst.msk [vmem:[%s2424_s22] sm:$0xff] %vm1485_vm13, %v1438_v59  ;;  %v1388_v20 = vmul.f32 0.6931472, %v1975_v56  ;;  %v1340_v0 = vsel %vm1337_vm2, %v1339_v47, %v1335_v12  ;;  %v1531_v58 = vpop.permute.xlu1 %1530  ;;  %vm1349_vm5 = vmor %vm1347_vm4, %vm1348_vm3 }
 0x28f   : > { %1567 = vst.msk [vmem:[%s2424_s22] sm:$0xff] %vm1566_vm15, %v1519_v62  ;;  %v1341_v27 = vmul.f32 %v2799_v40, %v1340_v0  ;;  %v1344_v42 = vsub.f32 1.0, %v1343_v24 }
 0x290   : > { %v1404_v55 = vsub.f32 %v2795_v28, %v1388_v20  ;;  %v1354_v28 = vor.u32 1.1754944e-38, %v1353_v35 }
 0x291   : > { %1419 = vst.msk [vmem:[%s2424_s22 + $0x70] sm:$0xff] %vm335_vm0, %v1341_v27  ;;  %v1345_v45 = vmul.f32 %v1973_v63, %v1344_v42 }
 0x292   : > { %1544 = vrot.lane.b32.xlu2 %v2659_v7, %s2040_s18  ;;  %1467 = vrot.lane.b32.xlu0 %v1404_v55, %s2040_s18 }
 0x293   : > { %v1346_v40 = vadd.f32 %v1973_v63, %v1345_v45 }
 0x294   : > { %v1446_v60 = vpop.permute.xlu2 %1445 }
 0x295   : > { %1490 = vst.msk [vmem:[%s2424_s22 + $0x20] sm:$0xff] %vm1485_vm13, %v1446_v60  ;;  %v1440_v39 = vpop.permute.xlu0 %1439  ;;  %v1350_v53 = vsel %vm1349_vm5, %v1973_v63, %v1346_v40 }
 0x296   : > { %1571 = vst.msk [vmem:[%s2424_s22 + $0x20] sm:$0xff] %vm1566_vm15, %v2861_v41  ;;  %v1355_v7 = vsel %vm1352_vm6, %v1354_v28, %v1350_v53 }
 0x297   : > { %1487 = vst.msk [vmem:[%s2424_s22 + $0x8] sm:$0xff] %vm1485_vm13, %v1440_v39  ;;  %v1356_v1 = vmul.f32 %v2832_v36, %v1355_v7 }
 0x298   : > { %1568 = vst.msk [vmem:[%s2424_s22 + $0x8] sm:$0xff] %vm1566_vm15, %v2844_v30 }
 0x299   : > { %1420 = vst.msk [vmem:[%s2424_s22 + $0x78] sm:$0xff] %vm335_vm0, %v1356_v1 }
 0x29a   : > { %1546 = vrot.lane.b32.xlu0 %v2693_v38, %s2040_s18  ;;  %s1996_s18 = scalar_lea.hbm %s2998_s7, 256 }
 0x29b   : > { %p1998_p1 = scmp.lt.s32.totalorder %s1996_s18, %s1992_s15 }
 0x29c   : > { %v1539_v48 = vpop.permute.xlu2 %1538  ;;  %v1442_v15 = vpop.permute.xlu1 %1441 }
 0x29d   : > { %1488 = vst.msk [vmem:[%s2424_s22 + $0x10] sm:$0xff] %vm1485_vm13, %v1442_v15  ;;  %v1535_v38 = vpop.permute.xlu0 %1534  ;;  %p1999_p2 = por %p1998_p1, %p1997_p0 }
 0x29e   : > { %1569 = vst.msk [vmem:[%s2424_s22 + $0x10] sm:$0xff] %vm1566_vm15, %v2849_v54 }
 0x29f   : > { %p2000_p3 = pnand %p1999_p2, %p1995_p13 }
 0x2a4   : > { %v1448_v36 = vpop.permute.xlu2 %1447  ;;  %v1444_v18 = vpop.permute.xlu1 %1443 }
 0x2a5   : > { %1491 = vst.msk [vmem:[%s2424_s22 + $0x28] sm:$0xff] %vm1485_vm13, %v1448_v36 }
 0x2a6   : > { %1572 = vst.msk [vmem:[%s2424_s22 + $0x28] sm:$0xff] %vm1566_vm15, %v2864_v33 }
 0x2a7   : > { %1489 = vst.msk [vmem:[%s2424_s22 + $0x18] sm:$0xff] %vm1485_vm13, %v1444_v18 }
 0x2a8   : > { %1570 = vst.msk [vmem:[%s2424_s22 + $0x18] sm:$0xff] %vm1566_vm15, %v1525_v51 }
 0x2ac   : > { %v1537_v54 = vpop.permute.xlu1 %1536 }
 0x2b4   : > { %v1454_v30 = vpop.permute.xlu2 %1453 }
 0x2b5   : > { %1494 = vst.msk [vmem:[%s2424_s22 + $0x40] sm:$0xff] %vm1485_vm13, %v1454_v30  ;;  %v1541_v57 = vpop.permute.xlu0 %1540 }
 0x2b6   : > { %1575 = vst.msk [vmem:[%s2424_s22 + $0x40] sm:$0xff] %vm1566_vm15, %v1535_v38 }
 0x2bd   : > { %v1543_v25 = vpop.permute.xlu1 %1542  ;;  %v1450_v14 = vpop.permute.xlu0 %1449 }
 0x2be   : > { %1492 = vst.msk [vmem:[%s2424_s22 + $0x30] sm:$0xff] %vm1485_vm13, %v1450_v14 }
 0x2bf   : > { %1573 = vst.msk [vmem:[%s2424_s22 + $0x30] sm:$0xff] %vm1566_vm15, %v1531_v58 }
 0x2c5   : > { %v1452_v8 = vpop.permute.xlu1 %1451 }
 0x2c6   : > { %1493 = vst.msk [vmem:[%s2424_s22 + $0x38] sm:$0xff] %vm1485_vm13, %v1452_v8 }
 0x2c7   : > { %1574 = vst.msk [vmem:[%s2424_s22 + $0x38] sm:$0xff] %vm1566_vm15, %v1533_v9 }
 0x2cc   : > { %v1460_v17 = vpop.permute.xlu2 %1459 }
 0x2cd   : > { %1497 = vst.msk [vmem:[%s2424_s22 + $0x58] sm:$0xff] %vm1485_vm13, %v1460_v17 }
 0x2ce   : > { %1578 = vst.msk [vmem:[%s2424_s22 + $0x58] sm:$0xff] %vm1566_vm15, %v1541_v57 }
 0x2d4   : > { %v1456_v2 = vpop.permute.xlu0 %1455 }
 0x2d5   : > { %1495 = vst.msk [vmem:[%s2424_s22 + $0x48] sm:$0xff] %vm1485_vm13, %v1456_v2 }
 0x2d6   : > { %1576 = vst.msk [vmem:[%s2424_s22 + $0x48] sm:$0xff] %vm1566_vm15, %v1537_v54 }
 0x2dc   : > { %v1458_v26 = vpop.permute.xlu1 %1457 }
 0x2dd   : > { %1496 = vst.msk [vmem:[%s2424_s22 + $0x50] sm:$0xff] %vm1485_vm13, %v1458_v26 }
 0x2de   : > { %1577 = vst.msk [vmem:[%s2424_s22 + $0x50] sm:$0xff] %vm1566_vm15, %v1539_v48 }
 0x2e4   : > { %v1466_v22 = vpop.permute.xlu2 %1465 }
 0x2e5   : > { %1500 = vst.msk [vmem:[%s2424_s22 + $0x70] sm:$0xff] %vm1485_vm13, %v1466_v22 }
 0x2ec   : > { %v1462_v5 = vpop.permute.xlu0 %1461  ;;  %v1545_v4 = vpop.permute.xlu2 %1544 }
 0x2ed   : > { %1498 = vst.msk [vmem:[%s2424_s22 + $0x60] sm:$0xff] %vm1485_vm13, %v1462_v5 }
 0x2ee   : > { %1579 = vst.msk [vmem:[%s2424_s22 + $0x60] sm:$0xff] %vm1566_vm15, %v1543_v25 }
 0x2f4   : > { %v1464_v6 = vpop.permute.xlu1 %1463 }
 0x2f5   : > { %1499 = vst.msk [vmem:[%s2424_s22 + $0x68] sm:$0xff] %vm1485_vm13, %v1464_v6 }
 0x2f6   : > { %1580 = vst.msk [vmem:[%s2424_s22 + $0x68] sm:$0xff] %vm1566_vm15, %v1545_v4 }
 0x2fc   : > { %v1549_v37 = vpop.permute.xlu1 %1548 }
 0x304   : > { %v1468_v34 = vpop.permute.xlu0 %1467 }
 0x305   : > { %1501 = vst.msk [vmem:[%s2424_s22 + $0x78] sm:$0xff] %vm1485_vm13, %v1468_v34 }
 0x306   : > { %1582 = vst.msk [vmem:[%s2424_s22 + $0x78] sm:$0xff] %vm1566_vm15, %v1549_v37 }
 0x30c   : > { %v1547_v13 = vpop.permute.xlu0 %1546 }
 0x30d   : > { %1581 = vst.msk [vmem:[%s2424_s22 + $0x70] sm:$0xff] %vm1566_vm15, %v1547_v13 }
 0x30e   : > { %2003 = shalt.err (!%p2000_p3)
}
 0x30f   : > { %s2041_s20 = smov 128   ;;  %s2042_s22 = smov 8  }
 0x310   : > { %1836 = dma.vmem_to_hbm [thread:$0]  (%p2121_p5), %s1597_s19, 2048, %s1599_s13, %s1584_s28, %s2041_s20, %s2041_s20, %s2042_s22  }
 0x311 PF: > { %p1842_p4 = scmp.ge.s32.totalorder %s2038_s27, 2  ;;  %s1613_s29 = sand.u32 1, %s2026_s24  }
 0x312   : > { %s1614_s8 = scalar_lea.sflag [#allocation3], %s1613_s29 }
 0x313   : > { %p1839_p7 = pnand %p1842_p4, %p2125_p6 }
 0x315   : > { %p1840_p8 = pneg %p1839_p7 }
 0x317   : > { %2021 = dma.done.wait (%p1840_p8), %s1614_s8, 2048  }
 0x318   : > { %2023 = vsyncadd (%p1840_p8), %s1614_s8, 4294965248  ;;  %p17_p9 = scmp.ge.s32.totalorder %s2108_s30, 4   ;;  %s3025_s24 = smov %s2030_s25 }
 0x319   : > { %s3026_s25 = smov %s2034_s26  ;;  %s3027_s26 = smov %s2119_s10 }
 0x31a   : > { %s3028_s27 = smov %s2108_s30  ;;  %19 = sbr.rel (!%p17_p9) target bundleno = 3 (0x3), region = 83 }
 0x31f   :  { %1620 = vsyncpa [#allocation3], 1 }
 0x320   :  { %1622 = vsyncpa [#allocation3 + $0x1], 1 }

</bundles_post_ra>
